<compile_context>
chip_gen: v7x
topology: tpu7x:2x2x1
jax: 0.10.0
libtpu: 0.0.40
codegen_flags: <defaults>
</compile_context>

<pallas_src>
import math

import jax
import jax.numpy as jnp
from jax import lax
from jax.experimental import pallas as pl
from jax.experimental.pallas import tpu as pltpu


_NEG_INF = -1e30   # below ELU's minimum (-1); safe max-pool padding value


# ---------------------------------------------------------------------------
# In-kernel building blocks (operate on loaded values + VMEM scratch refs)
# ---------------------------------------------------------------------------
def _attn_block(x, wqkv, wo, scale):
    """Single-head scaled-dot-product self-attention + residual.

    x: (L, D) f32, wqkv: (D, 3D) bf16, wo: (D, D) bf16 -> (y f32, attn f32).
    """
    L, D = x.shape
    xb = x.astype(jnp.bfloat16)
    qkv = jnp.dot(xb, wqkv, preferred_element_type=jnp.float32)          # (L, 3D)
    q = qkv[:, 0:D]
    k = qkv[:, D:2 * D]
    v = qkv[:, 2 * D:3 * D]
    s = jnp.dot(q.astype(jnp.bfloat16), k.T.astype(jnp.bfloat16),
                preferred_element_type=jnp.float32) * scale              # (L, L)
    m = jnp.max(s, axis=-1, keepdims=True)
    p = jnp.exp(s - m)
    denom = jnp.sum(p, axis=-1, keepdims=True)
    attn = p * pl.reciprocal(denom, approx=True)                         # softmax
    ctx = jnp.dot(attn.astype(jnp.bfloat16), v.astype(jnp.bfloat16),
                  preferred_element_type=jnp.float32)                    # (L, D)
    y = jnp.dot(ctx.astype(jnp.bfloat16), wo,
                preferred_element_type=jnp.float32) + x                  # residual
    return y, attn


def _conv_pool_block(x, w3, bias, cat_scratch, pool_scratch):
    """Conv1d(k=3, pad=1) + bias + ELU + MaxPool1d(3, stride=2, pad=1).

    x: (L, D) f32 (L even), w3: (3D, D) bf16 stacked [w_prev; w_mid; w_next],
    bias: (1, D) f32.  Returns (L // 2, D) f32.
    """
    L, D = x.shape
    Lout = L // 2
    zrow = jnp.zeros((1, D), jnp.float32)

    # Build the fused conv operand  xcat[i] = [x[i-1] | x[i] | x[i+1]]  (zero
    # padded at both ends) via offset stores into VMEM scratch, then one load.
    cat_scratch[pl.ds(2, L), 0:D] = x                    # prev tap: row 2+j = x[j]
    cat_scratch[pl.ds(1, 1), 0:D] = zrow                 # left zero pad
    cat_scratch[pl.ds(1, L), D:2 * D] = x                # centre tap
    cat_scratch[pl.ds(0, L), 2 * D:3 * D] = x            # next tap: row j = x[j]
    cat_scratch[pl.ds(L, 1), 2 * D:3 * D] = zrow         # right zero pad
    xcat = cat_scratch[pl.ds(1, L), :].astype(jnp.bfloat16)              # (L, 3D)

    y = jnp.dot(xcat, w3, preferred_element_type=jnp.float32) + bias     # conv
    # ELU(alpha=1).  TODO(synk): expm1 would be marginally more accurate.
    y = jnp.where(y > 0, y, jnp.exp(y) - 1.0)

    # MaxPool1d(3, stride=2, padding=1): out[i] = max(y[2i-1], y[2i], y[2i+1]).
    # Stage y at row offset 1 so row 0 holds the -inf pad; the stride-2 windows
    # then come out of three strided loads (no selection matmul, no reshape).
    pool_scratch[pl.ds(0, 1), :] = jnp.full((1, D), _NEG_INF, jnp.float32)
    pool_scratch[pl.ds(1, L), :] = y
    prev = pool_scratch[pl.ds(0, Lout, stride=2), :]                     # y[2i-1]
    even = pool_scratch[pl.ds(1, Lout, stride=2), :]                     # y[2i]
    odd = pool_scratch[pl.ds(2, Lout, stride=2), :]                      # y[2i+1]
    return jnp.maximum(jnp.maximum(prev, even), odd)


def _layernorm(x, gamma, beta, eps):
    mean = jnp.mean(x, axis=-1, keepdims=True)
    c = x - mean
    var = jnp.mean(c * c, axis=-1, keepdims=True)
    return c * lax.rsqrt(var + eps) * gamma + beta


# ---------------------------------------------------------------------------
# Fused encoder kernel (one grid step per batch element)
# ---------------------------------------------------------------------------
def _make_encoder_kernel(n_attn, n_conv, d_model, eps):
    scale = 1.0 / math.sqrt(d_model)
    n_in = 1 + 2 * n_attn + 2 * n_conv + 2
    n_out = 1 + n_attn

    def kernel(*refs):
        in_refs = refs[:n_in]
        out_refs = refs[n_in:n_in + n_out]
        cat_scratch, pool_scratch = refs[n_in + n_out:]

        x_ref = in_refs[0]
        pos = 1
        attn_w = [(in_refs[pos + 2 * i], in_refs[pos + 2 * i + 1])
                  for i in range(n_attn)]
        pos += 2 * n_attn
        conv_w = [(in_refs[pos + 2 * j], in_refs[pos + 2 * j + 1])
                  for j in range(n_conv)]
        pos += 2 * n_conv
        gamma_ref, beta_ref = in_refs[pos], in_refs[pos + 1]

        y_ref = out_refs[0]
        attn_refs = out_refs[1:]

        # Whole per-batch pipeline stays resident in VMEM / vregs.
        x = x_ref[0].astype(jnp.float32)                                 # (L0, D)
        for i in range(n_conv):
            wqkv_ref, wo_ref = attn_w[i]
            x, attn = _attn_block(x, wqkv_ref[...], wo_ref[...], scale)
            attn_refs[i][0] = attn.astype(attn_refs[i].dtype)
            cw_ref, cb_ref = conv_w[i]
            x = _conv_pool_block(x, cw_ref[...], cb_ref[...],
                                 cat_scratch, pool_scratch)
        wqkv_ref, wo_ref = attn_w[-1]
        x, attn = _attn_block(x, wqkv_ref[...], wo_ref[...], scale)
        attn_refs[-1][0] = attn.astype(attn_refs[-1].dtype)

        y_ref[0] = _layernorm(x, gamma_ref[...], beta_ref[...],
                              eps).astype(y_ref.dtype)

    return kernel


def encoder_forward(x, attn_params, conv_params, gamma, beta,
                    *, attn_dtype=jnp.bfloat16, eps=1e-5):
    """Fused Informer-Encoder forward.  Returns (y, [attn_0, ..., attn_n])."""
    B, L0, D = x.shape
    n_attn = len(attn_params)
    n_conv = len(conv_params)
    assert n_attn == n_conv + 1

    lens = [L0]
    for _ in range(n_conv):
        assert lens[-1] % 2 == 0, "even sequence lengths only (distilling pool)"
        lens.append(lens[-1] // 2)

    inputs = [x]
    in_specs = [pl.BlockSpec((1, L0, D), lambda b: (b, 0, 0))]
    for wqkv, wo in attn_params:
        inputs += [wqkv, wo]
        in_specs += [pl.BlockSpec((D, 3 * D), lambda b: (0, 0)),
                     pl.BlockSpec((D, D), lambda b: (0, 0))]
    for cw, cb in conv_params:
        inputs += [cw, cb]
        in_specs += [pl.BlockSpec((3 * D, D), lambda b: (0, 0)),
                     pl.BlockSpec((1, D), lambda b: (0, 0))]
    inputs += [gamma, beta]
    in_specs += [pl.BlockSpec((1, D), lambda b: (0, 0)),
                 pl.BlockSpec((1, D), lambda b: (0, 0))]

    out_shape = [jax.ShapeDtypeStruct((B, lens[-1], D), x.dtype)]
    out_specs = [pl.BlockSpec((1, lens[-1], D), lambda b: (b, 0, 0))]
    for Li in lens:
        out_shape.append(jax.ShapeDtypeStruct((B, Li, Li), attn_dtype))
        out_specs.append(pl.BlockSpec((1, Li, Li), lambda b: (b, 0, 0)))

    # Advisory cost estimate (matmul + softmax/ELU structure).
    flops = 0
    transcendentals = 0
    for Li in lens:
        flops += B * (2 * Li * D * 3 * D + 4 * Li * Li * D + 2 * Li * D * D)
        transcendentals += B * Li * Li
    for Li in lens[:-1]:
        flops += B * 2 * Li * 3 * D * D
        transcendentals += B * Li * D

    def _nbytes(shape, dtype):
        return math.prod(shape) * jnp.dtype(dtype).itemsize

    bytes_accessed = sum(int(a.size) * a.dtype.itemsize for a in inputs)
    bytes_accessed += sum(_nbytes(s.shape, s.dtype) for s in out_shape)

    # Explicit VMEM budget (v5e's default scoped limit is only 16 MiB).
    block_bytes = _nbytes((L0, D), x.dtype)
    block_bytes += sum(_nbytes(s.shape[1:], s.dtype) for s in out_shape)
    weight_bytes = sum(int(a.size) * a.dtype.itemsize for a in inputs[1:])
    scratch_bytes = (_nbytes((L0 + 2, 3 * D), jnp.float32)
                     + _nbytes((L0 + 1, D), jnp.float32))
    interm_bytes = 8 * _nbytes((L0, max(3 * D, L0)), jnp.float32)
    vmem_needed = 2 * block_bytes + 2 * weight_bytes + scratch_bytes + interm_bytes
    vmem_limit = int(min(48 * 2 ** 20, max(32 * 2 ** 20, 2 * vmem_needed)))

    outs = pl.pallas_call(
        _make_encoder_kernel(n_attn, n_conv, D, eps),
        out_shape=tuple(out_shape),
        grid=(B,),
        in_specs=in_specs,
        out_specs=tuple(out_specs),
        scratch_shapes=[pltpu.VMEM((L0 + 2, 3 * D), jnp.float32),   # conv taps
                        pltpu.VMEM((L0 + 1, D), jnp.float32)],      # pool staging
        compiler_params=pltpu.CompilerParams(
            dimension_semantics=("parallel",),   # batch split over cores (v7x)
            vmem_limit_bytes=vmem_limit),
        cost_estimate=pl.CostEstimate(flops=int(flops),
                                      transcendentals=int(transcendentals),
                                      bytes_accessed=int(bytes_accessed)),
    )(*inputs)
    return outs[0], list(outs[1:])


# ---------------------------------------------------------------------------
# Module wrapper (mirrors models/encoder.py::Encoder, conv-distilling branch)
# ---------------------------------------------------------------------------
class PallasEncoder:
    def __init__(self, d_model, n_attn_layers, n_conv_layers, key,
                 attn_dtype=jnp.bfloat16):
        assert n_attn_layers == n_conv_layers + 1
        self.d_model = d_model
        self.attn_dtype = attn_dtype
        ws = 0.5 / math.sqrt(d_model)
        keys = iter(jax.random.split(key, 4 * n_attn_layers + 2 * n_conv_layers + 2))

        self.attn_params = []
        for _ in range(n_attn_layers):
            wq = ws * jax.random.normal(next(keys), (d_model, d_model), jnp.float32)
            wk = ws * jax.random.normal(next(keys), (d_model, d_model), jnp.float32)
            wv = ws * jax.random.normal(next(keys), (d_model, d_model), jnp.float32)
            wo = ws * jax.random.normal(next(keys), (d_model, d_model), jnp.float32)
            wqkv = jnp.concatenate([wq, wk, wv], axis=1)                  # (D, 3D)
            self.attn_params.append((wqkv.astype(jnp.bfloat16),
                                     wo.astype(jnp.bfloat16)))

        self.conv_params = []
        for _ in range(n_conv_layers):
            w = ws * jax.random.normal(next(keys), (3, d_model, d_model), jnp.float32)
            b = 0.1 * jax.random.normal(next(keys), (1, d_model), jnp.float32)
            self.conv_params.append(
                (w.reshape(3 * d_model, d_model).astype(jnp.bfloat16), b))

        self.norm_gamma = 1.0 + 0.1 * jax.random.normal(next(keys), (1, d_model), jnp.float32)
        self.norm_beta = 0.1 * jax.random.normal(next(keys), (1, d_model), jnp.float32)

    def __call__(self, x, attn_mask=None):
        # TODO(synk): attention masking not implemented (reference uses None).
        assert attn_mask is None
        return encoder_forward(x, self.attn_params, self.conv_params,
                               self.norm_gamma, self.norm_beta,
                               attn_dtype=self.attn_dtype)


# ---------------------------------------------------------------------------
# Pure-JAX f32 reference (same synthetic sub-modules) for validation
# ---------------------------------------------------------------------------
def _encoder_reference(x, attn_params, conv_params, gamma, beta, eps=1e-5):
    D = x.shape[-1]
    scale = 1.0 / math.sqrt(D)

    def attn(x, wqkv, wo):
        qkv = x @ wqkv.astype(jnp.float32)
        q, k, v = qkv[..., :D], qkv[..., D:2 * D], qkv[..., 2 * D:]
        s = jnp.einsum("bld,bmd->blm", q, k) * scale
        a = jax.nn.softmax(s, axis=-1)
        ctx = jnp.einsum("blm,bmd->bld", a, v)
        return ctx @ wo.astype(jnp.float32) + x, a

    def conv_pool(x, w3, b):
        _, L, _ = x.shape
        xp = jnp.pad(x, ((0, 0), (1, 1), (0, 0)))
        xcat = jnp.concatenate([xp[:, 0:L], xp[:, 1:L + 1], xp[:, 2:L + 2]], axis=-1)
        y = xcat @ w3.astype(jnp.float32) + b
        y = jnp.where(y > 0, y, jnp.exp(y) - 1.0)
        yp = jnp.pad(y, ((0, 0), (1, 1), (0, 0)), constant_values=-jnp.inf)
        return jnp.stack([jnp.max(yp[:, 2 * i:2 * i + 3], axis=1)
                          for i in range(L // 2)], axis=1)

    attns = []
    for (wqkv, wo), (cw, cb) in zip(attn_params, conv_params):
        x, a = attn(x, wqkv, wo)
        attns.append(a)
        x = conv_pool(x, cw, cb)
    wqkv, wo = attn_params[-1]
    x, a = attn(x, wqkv, wo)
    attns.append(a)
    mean = jnp.mean(x, axis=-1, keepdims=True)
    var = jnp.mean((x - mean) ** 2, axis=-1, keepdims=True)
    x = (x - mean) * lax.rsqrt(var + eps) * gamma + beta
    return x, attns


if __name__ == "__main__":
    B, L, D = 2, 16, 32
    n_attn, n_conv = 3, 2

    root = jax.random.PRNGKey(0)
    kx, kp = jax.random.split(root)
    x = jax.random.normal(kx, (B, L, D), jnp.float32)

    enc = PallasEncoder(d_model=D, n_attn_layers=n_attn, n_conv_layers=n_conv, key=kp)
    y, attns = enc(x)

    y = jax.block_until_ready(y)
    attns = [jax.block_until_ready(a) for a in attns]

    assert y.shape == (B, L // (2 ** n_conv), D)
    assert [a.shape for a in attns] == [(B, 16, 16), (B, 8, 8), (B, 4, 4)]
    assert bool(jnp.all(jnp.isfinite(y)))

    # Cross-check against a pure-JAX f32 reference (loose tolerances account
    # for bf16 MXU inputs, approx reciprocal and bf16 attention outputs).
    y_ref, attns_ref = _encoder_reference(
        x, enc.attn_params, enc.conv_params, enc.norm_gamma, enc.norm_beta)
    assert float(jnp.max(jnp.abs(y - y_ref))) < 0.25
    for a, a_ref in zip(attns, attns_ref):
        assert float(jnp.max(jnp.abs(a.astype(jnp.float32) - a_ref))) < 0.1

    print("KERNEL_OK")
</pallas_src>

<mosaic_0001>
module attributes {stable_mosaic.version = 11 : i64} {
  func.func @kernel(%arg0: i32, %arg1: memref<1x16x32xf32, #tpu.memory_space<vmem>>, %arg2: memref<32x96xbf16, #tpu.memory_space<vmem>>, %arg3: memref<32x32xbf16, #tpu.memory_space<vmem>>, %arg4: memref<32x96xbf16, #tpu.memory_space<vmem>>, %arg5: memref<32x32xbf16, #tpu.memory_space<vmem>>, %arg6: memref<32x96xbf16, #tpu.memory_space<vmem>>, %arg7: memref<32x32xbf16, #tpu.memory_space<vmem>>, %arg8: memref<96x32xbf16, #tpu.memory_space<vmem>>, %arg9: memref<1x32xf32, #tpu.memory_space<vmem>>, %arg10: memref<96x32xbf16, #tpu.memory_space<vmem>>, %arg11: memref<1x32xf32, #tpu.memory_space<vmem>>, %arg12: memref<1x32xf32, #tpu.memory_space<vmem>>, %arg13: memref<1x32xf32, #tpu.memory_space<vmem>>, %arg14: memref<1x4x32xf32, #tpu.memory_space<vmem>>, %arg15: memref<1x16x16xbf16, #tpu.memory_space<vmem>>, %arg16: memref<1x8x8xbf16, #tpu.memory_space<vmem>>, %arg17: memref<1x4x4xbf16, #tpu.memory_space<vmem>>, %arg18: memref<18x96xf32, #tpu.memory_space<vmem>>, %arg19: memref<17x32xf32, #tpu.memory_space<vmem>>) attributes {dimension_semantics = [#tpu.dimension_semantics<parallel>], iteration_bounds = array<i64: 2>, scalar_prefetch = 0 : i64, scratch_operands = 2 : i64, tpu.core_type = #tpu.core_type<tc>, window_params = [{transform_indices = @transform_0, window_bounds = array<i64: 1, 16, 32>}, {pipeline_mode = #tpu.pipeline_mode<synchronous>, transform_indices = @transform_1, window_bounds = array<i64: 32, 96>}, {pipeline_mode = #tpu.pipeline_mode<synchronous>, transform_indices = @transform_2, window_bounds = array<i64: 32, 32>}, {pipeline_mode = #tpu.pipeline_mode<synchronous>, transform_indices = @transform_3, window_bounds = array<i64: 32, 96>}, {pipeline_mode = #tpu.pipeline_mode<synchronous>, transform_indices = @transform_4, window_bounds = array<i64: 32, 32>}, {pipeline_mode = #tpu.pipeline_mode<synchronous>, transform_indices = @transform_5, window_bounds = array<i64: 32, 96>}, {pipeline_mode = #tpu.pipeline_mode<synchronous>, transform_indices = @transform_6, window_bounds = array<i64: 32, 32>}, {pipeline_mode = #tpu.pipeline_mode<synchronous>, transform_indices = @transform_7, window_bounds = array<i64: 96, 32>}, {pipeline_mode = #tpu.pipeline_mode<synchronous>, transform_indices = @transform_8, window_bounds = array<i64: 1, 32>}, {pipeline_mode = #tpu.pipeline_mode<synchronous>, transform_indices = @transform_9, window_bounds = array<i64: 96, 32>}, {pipeline_mode = #tpu.pipeline_mode<synchronous>, transform_indices = @transform_10, window_bounds = array<i64: 1, 32>}, {pipeline_mode = #tpu.pipeline_mode<synchronous>, transform_indices = @transform_11, window_bounds = array<i64: 1, 32>}, {pipeline_mode = #tpu.pipeline_mode<synchronous>, transform_indices = @transform_12, window_bounds = array<i64: 1, 32>}, {transform_indices = @transform_13, window_bounds = array<i64: 1, 4, 32>}, {transform_indices = @transform_14, window_bounds = array<i64: 1, 16, 16>}, {transform_indices = @transform_15, window_bounds = array<i64: 1, 8, 8>}, {transform_indices = @transform_16, window_bounds = array<i64: 1, 4, 4>}]} {
    %c0 = arith.constant 0 : index
    %c0_0 = arith.constant 0 : index
    %c0_1 = arith.constant 0 : index
    %0 = vector.load %arg1[%c0, %c0_0, %c0_1] : memref<1x16x32xf32, #tpu.memory_space<vmem>>, vector<1x16x32xf32>
    %1 = vector.shape_cast %0 : vector<1x16x32xf32> to vector<16x32xf32>
    %c0_2 = arith.constant 0 : index
    %c0_3 = arith.constant 0 : index
    %2 = vector.load %arg2[%c0_2, %c0_3] : memref<32x96xbf16, #tpu.memory_space<vmem>>, vector<32x96xbf16>
    %c0_4 = arith.constant 0 : index
    %c0_5 = arith.constant 0 : index
    %3 = vector.load %arg3[%c0_4, %c0_5] : memref<32x32xbf16, #tpu.memory_space<vmem>>, vector<32x32xbf16>
    %4 = arith.truncf %1 : vector<16x32xf32> to vector<16x32xbf16>
    %cst = arith.constant dense<0.000000e+00> : vector<16x96xf32>
    %5 = tpu.matmul %4, %2, %cst {dimension_numbers = #tpu.dot_dimension_numbers<[1], [0], [0], [1], [0, 0, 1, 1], [], []>} : vector<16x32xbf16>, vector<32x96xbf16>, vector<16x96xf32> -> vector<16x96xf32>
    %6 = vector.extract_strided_slice %5 {offsets = [0, 0], sizes = [16, 32], strides = [1, 1]} : vector<16x96xf32> to vector<16x32xf32>
    %7 = vector.extract_strided_slice %5 {offsets = [0, 32], sizes = [16, 32], strides = [1, 1]} : vector<16x96xf32> to vector<16x32xf32>
    %8 = vector.extract_strided_slice %5 {offsets = [0, 64], sizes = [16, 32], strides = [1, 1]} : vector<16x96xf32> to vector<16x32xf32>
    %9 = arith.truncf %6 : vector<16x32xf32> to vector<16x32xbf16>
    %10 = tpu.transpose %7, [1, 0] : vector<16x32xf32> -> vector<32x16xf32>
    %11 = arith.truncf %10 : vector<32x16xf32> to vector<32x16xbf16>
    %cst_6 = arith.constant dense<0.000000e+00> : vector<16x16xf32>
    %12 = tpu.matmul %9, %11, %cst_6 {dimension_numbers = #tpu.dot_dimension_numbers<[1], [0], [0], [1], [0, 0, 1, 1], [], []>} : vector<16x32xbf16>, vector<32x16xbf16>, vector<16x16xf32> -> vector<16x16xf32>
    %cst_7 = arith.constant 0.176776692 : f32
    %13 = vector.broadcast %cst_7 : f32 to vector<16x16xf32>
    %14 = arith.mulf %12, %13 : vector<16x16xf32>
    %cst_8 = arith.constant dense<0xFF800000> : vector<16xf32>
    %15 = vector.multi_reduction <maximumf>, %14, %cst_8 [1] : vector<16x16xf32> to vector<16xf32>
    %16 = vector.shape_cast %15 : vector<16xf32> to vector<16x1xf32>
    %17 = vector.broadcast %16 : vector<16x1xf32> to vector<16x16xf32>
    %18 = arith.subf %14, %17 : vector<16x16xf32>
    %19 = math.exp %18 : vector<16x16xf32>
    %cst_9 = arith.constant dense<0.000000e+00> : vector<16xf32>
    %20 = vector.multi_reduction <add>, %19, %cst_9 [1] : vector<16x16xf32> to vector<16xf32>
    %21 = vector.shape_cast %20 : vector<16xf32> to vector<16x1xf32>
    %22 = tpu.reciprocal %21 {approx = true} : vector<16x1xf32> -> vector<16x1xf32>
    %23 = vector.broadcast %22 : vector<16x1xf32> to vector<16x16xf32>
    %24 = arith.mulf %19, %23 : vector<16x16xf32>
    %25 = arith.truncf %24 : vector<16x16xf32> to vector<16x16xbf16>
    %26 = arith.truncf %8 : vector<16x32xf32> to vector<16x32xbf16>
    %cst_10 = arith.constant dense<0.000000e+00> : vector<16x32xf32>
    %27 = tpu.matmul %25, %26, %cst_10 {dimension_numbers = #tpu.dot_dimension_numbers<[1], [0], [0], [1], [0, 0, 1, 1], [], []>} : vector<16x16xbf16>, vector<16x32xbf16>, vector<16x32xf32> -> vector<16x32xf32>
    %28 = arith.truncf %27 : vector<16x32xf32> to vector<16x32xbf16>
    %cst_11 = arith.constant dense<0.000000e+00> : vector<16x32xf32>
    %29 = tpu.matmul %28, %3, %cst_11 {dimension_numbers = #tpu.dot_dimension_numbers<[1], [0], [0], [1], [0, 0, 1, 1], [], []>} : vector<16x32xbf16>, vector<32x32xbf16>, vector<16x32xf32> -> vector<16x32xf32>
    %30 = arith.addf %29, %1 : vector<16x32xf32>
    %31 = arith.truncf %24 : vector<16x16xf32> to vector<16x16xbf16>
    %c0_12 = arith.constant 0 : index
    %c0_13 = arith.constant 0 : index
    %c0_14 = arith.constant 0 : index
    %32 = vector.load %arg15[%c0_12, %c0_13, %c0_14] : memref<1x16x16xbf16, #tpu.memory_space<vmem>>, vector<1x16x16xbf16>
    %33 = vector.shape_cast %32 : vector<1x16x16xbf16> to vector<16x16xbf16>
    %34 = vector.shape_cast %31 : vector<16x16xbf16> to vector<1x16x16xbf16>
    tpu.vector_store %arg15[%c0_12, %c0_13, %c0_14], %34 {strides = array<i32>} : memref<1x16x16xbf16, #tpu.memory_space<vmem>>, vector<1x16x16xbf16>,
    %c0_15 = arith.constant 0 : index
    %c0_16 = arith.constant 0 : index
    %35 = vector.load %arg8[%c0_15, %c0_16] : memref<96x32xbf16, #tpu.memory_space<vmem>>, vector<96x32xbf16>
    %c0_17 = arith.constant 0 : index
    %c0_18 = arith.constant 0 : index
    %36 = vector.load %arg9[%c0_17, %c0_18] : memref<1x32xf32, #tpu.memory_space<vmem>>, vector<1x32xf32>
    %cst_19 = arith.constant 0.000000e+00 : f32
    %37 = vector.broadcast %cst_19 : f32 to vector<1x32xf32>
    %c2 = arith.constant 2 : index
    %c0_20 = arith.constant 0 : index
    %38 = vector.load %arg18[%c2, %c0_20] : memref<18x96xf32, #tpu.memory_space<vmem>>, vector<16x32xf32>
    tpu.vector_store %arg18[%c2, %c0_20], %30 {strides = array<i32>} : memref<18x96xf32, #tpu.memory_space<vmem>>, vector<16x32xf32>,
    %c1 = arith.constant 1 : index
    %c0_21 = arith.constant 0 : index
    %39 = vector.load %arg18[%c1, %c0_21] : memref<18x96xf32, #tpu.memory_space<vmem>>, vector<1x32xf32>
    tpu.vector_store %arg18[%c1, %c0_21], %37 {strides = array<i32>} : memref<18x96xf32, #tpu.memory_space<vmem>>, vector<1x32xf32>,
    %c1_22 = arith.constant 1 : index
    %c32 = arith.constant 32 : index
    %40 = vector.load %arg18[%c1_22, %c32] : memref<18x96xf32, #tpu.memory_space<vmem>>, vector<16x32xf32>
    tpu.vector_store %arg18[%c1_22, %c32], %30 {strides = array<i32>} : memref<18x96xf32, #tpu.memory_space<vmem>>, vector<16x32xf32>,
    %c0_23 = arith.constant 0 : index
    %c64 = arith.constant 64 : index
    %41 = vector.load %arg18[%c0_23, %c64] : memref<18x96xf32, #tpu.memory_space<vmem>>, vector<16x32xf32>
    tpu.vector_store %arg18[%c0_23, %c64], %30 {strides = array<i32>} : memref<18x96xf32, #tpu.memory_space<vmem>>, vector<16x32xf32>,
    %c16 = arith.constant 16 : index
    %c64_24 = arith.constant 64 : index
    %42 = vector.load %arg18[%c16, %c64_24] : memref<18x96xf32, #tpu.memory_space<vmem>>, vector<1x32xf32>
    tpu.vector_store %arg18[%c16, %c64_24], %37 {strides = array<i32>} : memref<18x96xf32, #tpu.memory_space<vmem>>, vector<1x32xf32>,
    %c1_25 = arith.constant 1 : index
    %c0_26 = arith.constant 0 : index
    %43 = vector.load %arg18[%c1_25, %c0_26] : memref<18x96xf32, #tpu.memory_space<vmem>>, vector<16x96xf32>
    %44 = arith.truncf %43 : vector<16x96xf32> to vector<16x96xbf16>
    %cst_27 = arith.constant dense<0.000000e+00> : vector<16x32xf32>
    %45 = tpu.matmul %44, %35, %cst_27 {dimension_numbers = #tpu.dot_dimension_numbers<[1], [0], [0], [1], [0, 0, 1, 1], [], []>} : vector<16x96xbf16>, vector<96x32xbf16>, vector<16x32xf32> -> vector<16x32xf32>
    %46 = vector.broadcast %36 : vector<1x32xf32> to vector<16x32xf32>
    %47 = arith.addf %45, %46 : vector<16x32xf32>
    %cst_28 = arith.constant 0.000000e+00 : f32
    %48 = vector.broadcast %cst_28 : f32 to vector<16x32xf32>
    %49 = arith.cmpf ogt, %47, %48 : vector<16x32xf32>
    %50 = math.exp %47 : vector<16x32xf32>
    %cst_29 = arith.constant 1.000000e+00 : f32
    %51 = vector.broadcast %cst_29 : f32 to vector<16x32xf32>
    %52 = arith.subf %50, %51 : vector<16x32xf32>
    %53 = arith.select %49, %47, %52 : vector<16x32xi1>, vector<16x32xf32>
    %cst_30 = arith.constant -1.000000e+30 : f32
    %54 = vector.broadcast %cst_30 : f32 to vector<1x32xf32>
    %c0_31 = arith.constant 0 : index
    %c0_32 = arith.constant 0 : index
    %55 = vector.load %arg19[%c0_31, %c0_32] : memref<17x32xf32, #tpu.memory_space<vmem>>, vector<1x32xf32>
    tpu.vector_store %arg19[%c0_31, %c0_32], %54 {strides = array<i32>} : memref<17x32xf32, #tpu.memory_space<vmem>>, vector<1x32xf32>,
    %c1_33 = arith.constant 1 : index
    %c0_34 = arith.constant 0 : index
    %56 = vector.load %arg19[%c1_33, %c0_34] : memref<17x32xf32, #tpu.memory_space<vmem>>, vector<16x32xf32>
    tpu.vector_store %arg19[%c1_33, %c0_34], %53 {strides = array<i32>} : memref<17x32xf32, #tpu.memory_space<vmem>>, vector<16x32xf32>,
    %c0_35 = arith.constant 0 : index
    %c0_36 = arith.constant 0 : index
    %57 = tpu.strided_load %arg19[%c0_35, %c0_36] {strides = array<i32: 2, 1>} : memref<17x32xf32, #tpu.memory_space<vmem>>, vector<8x32xf32>
    %c1_37 = arith.constant 1 : index
    %c0_38 = arith.constant 0 : index
    %58 = tpu.strided_load %arg19[%c1_37, %c0_38] {strides = array<i32: 2, 1>} : memref<17x32xf32, #tpu.memory_space<vmem>>, vector<8x32xf32>
    %c2_39 = arith.constant 2 : index
    %c0_40 = arith.constant 0 : index
    %59 = tpu.strided_load %arg19[%c2_39, %c0_40] {strides = array<i32: 2, 1>} : memref<17x32xf32, #tpu.memory_space<vmem>>, vector<8x32xf32>
    %60 = arith.maximumf %57, %58 : vector<8x32xf32>
    %61 = arith.maximumf %60, %59 : vector<8x32xf32>
    %c0_41 = arith.constant 0 : index
    %c0_42 = arith.constant 0 : index
    %62 = vector.load %arg4[%c0_41, %c0_42] : memref<32x96xbf16, #tpu.memory_space<vmem>>, vector<32x96xbf16>
    %c0_43 = arith.constant 0 : index
    %c0_44 = arith.constant 0 : index
    %63 = vector.load %arg5[%c0_43, %c0_44] : memref<32x32xbf16, #tpu.memory_space<vmem>>, vector<32x32xbf16>
    %64 = arith.truncf %61 : vector<8x32xf32> to vector<8x32xbf16>
    %cst_45 = arith.constant dense<0.000000e+00> : vector<8x96xf32>
    %65 = tpu.matmul %64, %62, %cst_45 {dimension_numbers = #tpu.dot_dimension_numbers<[1], [0], [0], [1], [0, 0, 1, 1], [], []>} : vector<8x32xbf16>, vector<32x96xbf16>, vector<8x96xf32> -> vector<8x96xf32>
    %66 = vector.extract_strided_slice %65 {offsets = [0, 0], sizes = [8, 32], strides = [1, 1]} : vector<8x96xf32> to vector<8x32xf32>
    %67 = vector.extract_strided_slice %65 {offsets = [0, 32], sizes = [8, 32], strides = [1, 1]} : vector<8x96xf32> to vector<8x32xf32>
    %68 = vector.extract_strided_slice %65 {offsets = [0, 64], sizes = [8, 32], strides = [1, 1]} : vector<8x96xf32> to vector<8x32xf32>
    %69 = arith.truncf %66 : vector<8x32xf32> to vector<8x32xbf16>
    %70 = tpu.transpose %67, [1, 0] : vector<8x32xf32> -> vector<32x8xf32>
    %71 = arith.truncf %70 : vector<32x8xf32> to vector<32x8xbf16>
    %cst_46 = arith.constant dense<0.000000e+00> : vector<8x8xf32>
    %72 = tpu.matmul %69, %71, %cst_46 {dimension_numbers = #tpu.dot_dimension_numbers<[1], [0], [0], [1], [0, 0, 1, 1], [], []>} : vector<8x32xbf16>, vector<32x8xbf16>, vector<8x8xf32> -> vector<8x8xf32>
    %cst_47 = arith.constant 0.176776692 : f32
    %73 = vector.broadcast %cst_47 : f32 to vector<8x8xf32>
    %74 = arith.mulf %72, %73 : vector<8x8xf32>
    %cst_48 = arith.constant dense<0xFF800000> : vector<8xf32>
    %75 = vector.multi_reduction <maximumf>, %74, %cst_48 [1] : vector<8x8xf32> to vector<8xf32>
    %76 = vector.shape_cast %75 : vector<8xf32> to vector<8x1xf32>
    %77 = vector.broadcast %76 : vector<8x1xf32> to vector<8x8xf32>
    %78 = arith.subf %74, %77 : vector<8x8xf32>
    %79 = math.exp %78 : vector<8x8xf32>
    %cst_49 = arith.constant dense<0.000000e+00> : vector<8xf32>
    %80 = vector.multi_reduction <add>, %79, %cst_49 [1] : vector<8x8xf32> to vector<8xf32>
    %81 = vector.shape_cast %80 : vector<8xf32> to vector<8x1xf32>
    %82 = tpu.reciprocal %81 {approx = true} : vector<8x1xf32> -> vector<8x1xf32>
    %83 = vector.broadcast %82 : vector<8x1xf32> to vector<8x8xf32>
    %84 = arith.mulf %79, %83 : vector<8x8xf32>
    %85 = arith.truncf %84 : vector<8x8xf32> to vector<8x8xbf16>
    %86 = arith.truncf %68 : vector<8x32xf32> to vector<8x32xbf16>
    %cst_50 = arith.constant dense<0.000000e+00> : vector<8x32xf32>
    %87 = tpu.matmul %85, %86, %cst_50 {dimension_numbers = #tpu.dot_dimension_numbers<[1], [0], [0], [1], [0, 0, 1, 1], [], []>} : vector<8x8xbf16>, vector<8x32xbf16>, vector<8x32xf32> -> vector<8x32xf32>
    %88 = arith.truncf %87 : vector<8x32xf32> to vector<8x32xbf16>
    %cst_51 = arith.constant dense<0.000000e+00> : vector<8x32xf32>
    %89 = tpu.matmul %88, %63, %cst_51 {dimension_numbers = #tpu.dot_dimension_numbers<[1], [0], [0], [1], [0, 0, 1, 1], [], []>} : vector<8x32xbf16>, vector<32x32xbf16>, vector<8x32xf32> -> vector<8x32xf32>
    %90 = arith.addf %89, %61 : vector<8x32xf32>
    %91 = arith.truncf %84 : vector<8x8xf32> to vector<8x8xbf16>
    %c0_52 = arith.constant 0 : index
    %c0_53 = arith.constant 0 : index
    %c0_54 = arith.constant 0 : index
    %92 = vector.load %arg16[%c0_52, %c0_53, %c0_54] : memref<1x8x8xbf16, #tpu.memory_space<vmem>>, vector<1x8x8xbf16>
    %93 = vector.shape_cast %92 : vector<1x8x8xbf16> to vector<8x8xbf16>
    %94 = vector.shape_cast %91 : vector<8x8xbf16> to vector<1x8x8xbf16>
    tpu.vector_store %arg16[%c0_52, %c0_53, %c0_54], %94 {strides = array<i32>} : memref<1x8x8xbf16, #tpu.memory_space<vmem>>, vector<1x8x8xbf16>,
    %c0_55 = arith.constant 0 : index
    %c0_56 = arith.constant 0 : index
    %95 = vector.load %arg10[%c0_55, %c0_56] : memref<96x32xbf16, #tpu.memory_space<vmem>>, vector<96x32xbf16>
    %c0_57 = arith.constant 0 : index
    %c0_58 = arith.constant 0 : index
    %96 = vector.load %arg11[%c0_57, %c0_58] : memref<1x32xf32, #tpu.memory_space<vmem>>, vector<1x32xf32>
    %cst_59 = arith.constant 0.000000e+00 : f32
    %97 = vector.broadcast %cst_59 : f32 to vector<1x32xf32>
    %c2_60 = arith.constant 2 : index
    %c0_61 = arith.constant 0 : index
    %98 = vector.load %arg18[%c2_60, %c0_61] : memref<18x96xf32, #tpu.memory_space<vmem>>, vector<8x32xf32>
    tpu.vector_store %arg18[%c2_60, %c0_61], %90 {strides = array<i32>} : memref<18x96xf32, #tpu.memory_space<vmem>>, vector<8x32xf32>,
    %c1_62 = arith.constant 1 : index
    %c0_63 = arith.constant 0 : index
    %99 = vector.load %arg18[%c1_62, %c0_63] : memref<18x96xf32, #tpu.memory_space<vmem>>, vector<1x32xf32>
    tpu.vector_store %arg18[%c1_62, %c0_63], %97 {strides = array<i32>} : memref<18x96xf32, #tpu.memory_space<vmem>>, vector<1x32xf32>,
    %c1_64 = arith.constant 1 : index
    %c32_65 = arith.constant 32 : index
    %100 = vector.load %arg18[%c1_64, %c32_65] : memref<18x96xf32, #tpu.memory_space<vmem>>, vector<8x32xf32>
    tpu.vector_store %arg18[%c1_64, %c32_65], %90 {strides = array<i32>} : memref<18x96xf32, #tpu.memory_space<vmem>>, vector<8x32xf32>,
    %c0_66 = arith.constant 0 : index
    %c64_67 = arith.constant 64 : index
    %101 = vector.load %arg18[%c0_66, %c64_67] : memref<18x96xf32, #tpu.memory_space<vmem>>, vector<8x32xf32>
    tpu.vector_store %arg18[%c0_66, %c64_67], %90 {strides = array<i32>} : memref<18x96xf32, #tpu.memory_space<vmem>>, vector<8x32xf32>,
    %c8 = arith.constant 8 : index
    %c64_68 = arith.constant 64 : index
    %102 = vector.load %arg18[%c8, %c64_68] : memref<18x96xf32, #tpu.memory_space<vmem>>, vector<1x32xf32>
    tpu.vector_store %arg18[%c8, %c64_68], %97 {strides = array<i32>} : memref<18x96xf32, #tpu.memory_space<vmem>>, vector<1x32xf32>,
    %c1_69 = arith.constant 1 : index
    %c0_70 = arith.constant 0 : index
    %103 = vector.load %arg18[%c1_69, %c0_70] : memref<18x96xf32, #tpu.memory_space<vmem>>, vector<8x96xf32>
    %104 = arith.truncf %103 : vector<8x96xf32> to vector<8x96xbf16>
    %cst_71 = arith.constant dense<0.000000e+00> : vector<8x32xf32>
    %105 = tpu.matmul %104, %95, %cst_71 {dimension_numbers = #tpu.dot_dimension_numbers<[1], [0], [0], [1], [0, 0, 1, 1], [], []>} : vector<8x96xbf16>, vector<96x32xbf16>, vector<8x32xf32> -> vector<8x32xf32>
    %106 = vector.broadcast %96 : vector<1x32xf32> to vector<8x32xf32>
    %107 = arith.addf %105, %106 : vector<8x32xf32>
    %cst_72 = arith.constant 0.000000e+00 : f32
    %108 = vector.broadcast %cst_72 : f32 to vector<8x32xf32>
    %109 = arith.cmpf ogt, %107, %108 : vector<8x32xf32>
    %110 = math.exp %107 : vector<8x32xf32>
    %cst_73 = arith.constant 1.000000e+00 : f32
    %111 = vector.broadcast %cst_73 : f32 to vector<8x32xf32>
    %112 = arith.subf %110, %111 : vector<8x32xf32>
    %113 = arith.select %109, %107, %112 : vector<8x32xi1>, vector<8x32xf32>
    %cst_74 = arith.constant -1.000000e+30 : f32
    %114 = vector.broadcast %cst_74 : f32 to vector<1x32xf32>
    %c0_75 = arith.constant 0 : index
    %c0_76 = arith.constant 0 : index
    %115 = vector.load %arg19[%c0_75, %c0_76] : memref<17x32xf32, #tpu.memory_space<vmem>>, vector<1x32xf32>
    tpu.vector_store %arg19[%c0_75, %c0_76], %114 {strides = array<i32>} : memref<17x32xf32, #tpu.memory_space<vmem>>, vector<1x32xf32>,
    %c1_77 = arith.constant 1 : index
    %c0_78 = arith.constant 0 : index
    %116 = vector.load %arg19[%c1_77, %c0_78] : memref<17x32xf32, #tpu.memory_space<vmem>>, vector<8x32xf32>
    tpu.vector_store %arg19[%c1_77, %c0_78], %113 {strides = array<i32>} : memref<17x32xf32, #tpu.memory_space<vmem>>, vector<8x32xf32>,
    %c0_79 = arith.constant 0 : index
    %c0_80 = arith.constant 0 : index
    %117 = tpu.strided_load %arg19[%c0_79, %c0_80] {strides = array<i32: 2, 1>} : memref<17x32xf32, #tpu.memory_space<vmem>>, vector<4x32xf32>
    %c1_81 = arith.constant 1 : index
    %c0_82 = arith.constant 0 : index
    %118 = tpu.strided_load %arg19[%c1_81, %c0_82] {strides = array<i32: 2, 1>} : memref<17x32xf32, #tpu.memory_space<vmem>>, vector<4x32xf32>
    %c2_83 = arith.constant 2 : index
    %c0_84 = arith.constant 0 : index
    %119 = tpu.strided_load %arg19[%c2_83, %c0_84] {strides = array<i32: 2, 1>} : memref<17x32xf32, #tpu.memory_space<vmem>>, vector<4x32xf32>
    %120 = arith.maximumf %117, %118 : vector<4x32xf32>
    %121 = arith.maximumf %120, %119 : vector<4x32xf32>
    %c0_85 = arith.constant 0 : index
    %c0_86 = arith.constant 0 : index
    %122 = vector.load %arg6[%c0_85, %c0_86] : memref<32x96xbf16, #tpu.memory_space<vmem>>, vector<32x96xbf16>
    %c0_87 = arith.constant 0 : index
    %c0_88 = arith.constant 0 : index
    %123 = vector.load %arg7[%c0_87, %c0_88] : memref<32x32xbf16, #tpu.memory_space<vmem>>, vector<32x32xbf16>
    %124 = arith.truncf %121 : vector<4x32xf32> to vector<4x32xbf16>
    %cst_89 = arith.constant dense<0.000000e+00> : vector<4x96xf32>
    %125 = tpu.matmul %124, %122, %cst_89 {dimension_numbers = #tpu.dot_dimension_numbers<[1], [0], [0], [1], [0, 0, 1, 1], [], []>} : vector<4x32xbf16>, vector<32x96xbf16>, vector<4x96xf32> -> vector<4x96xf32>
    %126 = vector.extract_strided_slice %125 {offsets = [0, 0], sizes = [4, 32], strides = [1, 1]} : vector<4x96xf32> to vector<4x32xf32>
    %127 = vector.extract_strided_slice %125 {offsets = [0, 32], sizes = [4, 32], strides = [1, 1]} : vector<4x96xf32> to vector<4x32xf32>
    %128 = vector.extract_strided_slice %125 {offsets = [0, 64], sizes = [4, 32], strides = [1, 1]} : vector<4x96xf32> to vector<4x32xf32>
    %129 = arith.truncf %126 : vector<4x32xf32> to vector<4x32xbf16>
    %130 = tpu.transpose %127, [1, 0] : vector<4x32xf32> -> vector<32x4xf32>
    %131 = arith.truncf %130 : vector<32x4xf32> to vector<32x4xbf16>
    %cst_90 = arith.constant dense<0.000000e+00> : vector<4x4xf32>
    %132 = tpu.matmul %129, %131, %cst_90 {dimension_numbers = #tpu.dot_dimension_numbers<[1], [0], [0], [1], [0, 0, 1, 1], [], []>} : vector<4x32xbf16>, vector<32x4xbf16>, vector<4x4xf32> -> vector<4x4xf32>
    %cst_91 = arith.constant 0.176776692 : f32
    %133 = vector.broadcast %cst_91 : f32 to vector<4x4xf32>
    %134 = arith.mulf %132, %133 : vector<4x4xf32>
    %cst_92 = arith.constant dense<0xFF800000> : vector<4xf32>
    %135 = vector.multi_reduction <maximumf>, %134, %cst_92 [1] : vector<4x4xf32> to vector<4xf32>
    %136 = vector.shape_cast %135 : vector<4xf32> to vector<4x1xf32>
    %137 = vector.broadcast %136 : vector<4x1xf32> to vector<4x4xf32>
    %138 = arith.subf %134, %137 : vector<4x4xf32>
    %139 = math.exp %138 : vector<4x4xf32>
    %cst_93 = arith.constant dense<0.000000e+00> : vector<4xf32>
    %140 = vector.multi_reduction <add>, %139, %cst_93 [1] : vector<4x4xf32> to vector<4xf32>
    %141 = vector.shape_cast %140 : vector<4xf32> to vector<4x1xf32>
    %142 = tpu.reciprocal %141 {approx = true} : vector<4x1xf32> -> vector<4x1xf32>
    %143 = vector.broadcast %142 : vector<4x1xf32> to vector<4x4xf32>
    %144 = arith.mulf %139, %143 : vector<4x4xf32>
    %145 = arith.truncf %144 : vector<4x4xf32> to vector<4x4xbf16>
    %146 = arith.truncf %128 : vector<4x32xf32> to vector<4x32xbf16>
    %cst_94 = arith.constant dense<0.000000e+00> : vector<4x32xf32>
    %147 = tpu.matmul %145, %146, %cst_94 {dimension_numbers = #tpu.dot_dimension_numbers<[1], [0], [0], [1], [0, 0, 1, 1], [], []>} : vector<4x4xbf16>, vector<4x32xbf16>, vector<4x32xf32> -> vector<4x32xf32>
    %148 = arith.truncf %147 : vector<4x32xf32> to vector<4x32xbf16>
    %cst_95 = arith.constant dense<0.000000e+00> : vector<4x32xf32>
    %149 = tpu.matmul %148, %123, %cst_95 {dimension_numbers = #tpu.dot_dimension_numbers<[1], [0], [0], [1], [0, 0, 1, 1], [], []>} : vector<4x32xbf16>, vector<32x32xbf16>, vector<4x32xf32> -> vector<4x32xf32>
    %150 = arith.addf %149, %121 : vector<4x32xf32>
    %151 = arith.truncf %144 : vector<4x4xf32> to vector<4x4xbf16>
    %c0_96 = arith.constant 0 : index
    %c0_97 = arith.constant 0 : index
    %c0_98 = arith.constant 0 : index
    %152 = vector.load %arg17[%c0_96, %c0_97, %c0_98] : memref<1x4x4xbf16, #tpu.memory_space<vmem>>, vector<1x4x4xbf16>
    %153 = vector.shape_cast %152 : vector<1x4x4xbf16> to vector<4x4xbf16>
    %154 = vector.shape_cast %151 : vector<4x4xbf16> to vector<1x4x4xbf16>
    tpu.vector_store %arg17[%c0_96, %c0_97, %c0_98], %154 {strides = array<i32>} : memref<1x4x4xbf16, #tpu.memory_space<vmem>>, vector<1x4x4xbf16>,
    %c0_99 = arith.constant 0 : index
    %c0_100 = arith.constant 0 : index
    %155 = vector.load %arg12[%c0_99, %c0_100] : memref<1x32xf32, #tpu.memory_space<vmem>>, vector<1x32xf32>
    %c0_101 = arith.constant 0 : index
    %c0_102 = arith.constant 0 : index
    %156 = vector.load %arg13[%c0_101, %c0_102] : memref<1x32xf32, #tpu.memory_space<vmem>>, vector<1x32xf32>
    %cst_103 = arith.constant dense<0.000000e+00> : vector<4xf32>
    %157 = vector.multi_reduction <add>, %150, %cst_103 [1] : vector<4x32xf32> to vector<4xf32>
    %158 = vector.shape_cast %157 : vector<4xf32> to vector<4x1xf32>
    %cst_104 = arith.constant 3.200000e+01 : f32
    %159 = vector.broadcast %cst_104 : f32 to vector<4x1xf32>
    %160 = arith.divf %158, %159 : vector<4x1xf32>
    %161 = vector.broadcast %160 : vector<4x1xf32> to vector<4x32xf32>
    %162 = arith.subf %150, %161 : vector<4x32xf32>
    %163 = arith.mulf %162, %162 : vector<4x32xf32>
    %cst_105 = arith.constant dense<0.000000e+00> : vector<4xf32>
    %164 = vector.multi_reduction <add>, %163, %cst_105 [1] : vector<4x32xf32> to vector<4xf32>
    %165 = vector.shape_cast %164 : vector<4xf32> to vector<4x1xf32>
    %cst_106 = arith.constant 3.200000e+01 : f32
    %166 = vector.broadcast %cst_106 : f32 to vector<4x1xf32>
    %167 = arith.divf %165, %166 : vector<4x1xf32>
    %cst_107 = arith.constant 9.99999974E-6 : f32
    %168 = vector.broadcast %cst_107 : f32 to vector<4x1xf32>
    %169 = arith.addf %167, %168 : vector<4x1xf32>
    %170 = math.rsqrt %169 : vector<4x1xf32>
    %171 = vector.broadcast %170 : vector<4x1xf32> to vector<4x32xf32>
    %172 = arith.mulf %162, %171 : vector<4x32xf32>
    %173 = vector.broadcast %155 : vector<1x32xf32> to vector<4x32xf32>
    %174 = arith.mulf %172, %173 : vector<4x32xf32>
    %175 = vector.broadcast %156 : vector<1x32xf32> to vector<4x32xf32>
    %176 = arith.addf %174, %175 : vector<4x32xf32>
    %c0_108 = arith.constant 0 : index
    %c0_109 = arith.constant 0 : index
    %c0_110 = arith.constant 0 : index
    %177 = vector.load %arg14[%c0_108, %c0_109, %c0_110] : memref<1x4x32xf32, #tpu.memory_space<vmem>>, vector<1x4x32xf32>
    %178 = vector.shape_cast %177 : vector<1x4x32xf32> to vector<4x32xf32>
    %179 = vector.shape_cast %176 : vector<4x32xf32> to vector<1x4x32xf32>
    tpu.vector_store %arg14[%c0_108, %c0_109, %c0_110], %179 {strides = array<i32>} : memref<1x4x32xf32, #tpu.memory_space<vmem>>, vector<1x4x32xf32>,
    return
  }
  func.func @transform_0(%arg0: i32) -> (i32, i32, i32) {
    %c0_i32 = arith.constant 0 : i32
    %c0_i32_0 = arith.constant 0 : i32
    %c0_i32_1 = arith.constant 0 : i32
    return %arg0, %c0_i32, %c0_i32_0 : i32, i32, i32
  }
  func.func @transform_1(%arg0: i32) -> (i32, i32) {
    %c0_i32 = arith.constant 0 : i32
    %c0_i32_0 = arith.constant 0 : i32
    %c0_i32_1 = arith.constant 0 : i32
    return %c0_i32, %c0_i32_0 : i32, i32
  }
  func.func @transform_2(%arg0: i32) -> (i32, i32) {
    %c0_i32 = arith.constant 0 : i32
    %c0_i32_0 = arith.constant 0 : i32
    %c0_i32_1 = arith.constant 0 : i32
    return %c0_i32, %c0_i32_0 : i32, i32
  }
  func.func @transform_3(%arg0: i32) -> (i32, i32) {
    %c0_i32 = arith.constant 0 : i32
    %c0_i32_0 = arith.constant 0 : i32
    %c0_i32_1 = arith.constant 0 : i32
    return %c0_i32, %c0_i32_0 : i32, i32
  }
  func.func @transform_4(%arg0: i32) -> (i32, i32) {
    %c0_i32 = arith.constant 0 : i32
    %c0_i32_0 = arith.constant 0 : i32
    %c0_i32_1 = arith.constant 0 : i32
    return %c0_i32, %c0_i32_0 : i32, i32
  }
  func.func @transform_5(%arg0: i32) -> (i32, i32) {
    %c0_i32 = arith.constant 0 : i32
    %c0_i32_0 = arith.constant 0 : i32
    %c0_i32_1 = arith.constant 0 : i32
    return %c0_i32, %c0_i32_0 : i32, i32
  }
  func.func @transform_6(%arg0: i32) -> (i32, i32) {
    %c0_i32 = arith.constant 0 : i32
    %c0_i32_0 = arith.constant 0 : i32
    %c0_i32_1 = arith.constant 0 : i32
    return %c0_i32, %c0_i32_0 : i32, i32
  }
  func.func @transform_7(%arg0: i32) -> (i32, i32) {
    %c0_i32 = arith.constant 0 : i32
    %c0_i32_0 = arith.constant 0 : i32
    %c0_i32_1 = arith.constant 0 : i32
    return %c0_i32, %c0_i32_0 : i32, i32
  }
  func.func @transform_8(%arg0: i32) -> (i32, i32) {
    %c0_i32 = arith.constant 0 : i32
    %c0_i32_0 = arith.constant 0 : i32
    %c0_i32_1 = arith.constant 0 : i32
    return %c0_i32, %c0_i32_0 : i32, i32
  }
  func.func @transform_9(%arg0: i32) -> (i32, i32) {
    %c0_i32 = arith.constant 0 : i32
    %c0_i32_0 = arith.constant 0 : i32
    %c0_i32_1 = arith.constant 0 : i32
    return %c0_i32, %c0_i32_0 : i32, i32
  }
  func.func @transform_10(%arg0: i32) -> (i32, i32) {
    %c0_i32 = arith.constant 0 : i32
    %c0_i32_0 = arith.constant 0 : i32
    %c0_i32_1 = arith.constant 0 : i32
    return %c0_i32, %c0_i32_0 : i32, i32
  }
  func.func @transform_11(%arg0: i32) -> (i32, i32) {
    %c0_i32 = arith.constant 0 : i32
    %c0_i32_0 = arith.constant 0 : i32
    %c0_i32_1 = arith.constant 0 : i32
    return %c0_i32, %c0_i32_0 : i32, i32
  }
  func.func @transform_12(%arg0: i32) -> (i32, i32) {
    %c0_i32 = arith.constant 0 : i32
    %c0_i32_0 = arith.constant 0 : i32
    %c0_i32_1 = arith.constant 0 : i32
    return %c0_i32, %c0_i32_0 : i32, i32
  }
  func.func @transform_13(%arg0: i32) -> (i32, i32, i32) {
    %c0_i32 = arith.constant 0 : i32
    %c0_i32_0 = arith.constant 0 : i32
    %c0_i32_1 = arith.constant 0 : i32
    return %arg0, %c0_i32, %c0_i32_0 : i32, i32, i32
  }
  func.func @transform_14(%arg0: i32) -> (i32, i32, i32) {
    %c0_i32 = arith.constant 0 : i32
    %c0_i32_0 = arith.constant 0 : i32
    %c0_i32_1 = arith.constant 0 : i32
    return %arg0, %c0_i32, %c0_i32_0 : i32, i32, i32
  }
  func.func @transform_15(%arg0: i32) -> (i32, i32, i32) {
    %c0_i32 = arith.constant 0 : i32
    %c0_i32_0 = arith.constant 0 : i32
    %c0_i32_1 = arith.constant 0 : i32
    return %arg0, %c0_i32, %c0_i32_0 : i32, i32, i32
  }
  func.func @transform_16(%arg0: i32) -> (i32, i32, i32) {
    %c0_i32 = arith.constant 0 : i32
    %c0_i32_0 = arith.constant 0 : i32
    %c0_i32_1 = arith.constant 0 : i32
    return %arg0, %c0_i32, %c0_i32_0 : i32, i32, i32
  }
}

</mosaic_0001>

<bundles_post_ra>
// kernel: tpu_custom_call.1
= control target key start
LH: loop header
LB: loop body
LE: loop exit
PB: predicated region body
PF: predicated region fallthrough
CT: control target
= control target key end

     0   :  { %s2952_s0 = inlined_call_operand.vmem [shape: f32[2,16,32], index: 0, kind: input, shape index: {}]   ;;  %s2953_s1 = inlined_call_operand.vmem [shape: bf16[32,96], index: 1, kind: input, shape index: {}]   ;;  %s2954_s2 = inlined_call_operand.vmem [shape: bf16[32,32], index: 2, kind: input, shape index: {}]   ;;  %s2955_s3 = inlined_call_operand.vmem [shape: bf16[32,96], index: 3, kind: input, shape index: {}]   ;;  %s2956_s4 = inlined_call_operand.vmem [shape: bf16[32,32], index: 4, kind: input, shape index: {}]   ;;  %s2957_s5 = inlined_call_operand.vmem [shape: bf16[32,96], index: 5, kind: input, shape index: {}]   ;;  %s2958_s6 = inlined_call_operand.vmem [shape: bf16[32,32], index: 6, kind: input, shape index: {}]   ;;  %s2959_s7 = inlined_call_operand.vmem [shape: bf16[96,32], index: 7, kind: input, shape index: {}]   ;;  %s2960_s8 = inlined_call_operand.vmem [shape: f32[1,32], index: 8, kind: input, shape index: {}]   ;;  %s2961_s9 = inlined_call_operand.vmem [shape: bf16[96,32], index: 9, kind: input, shape index: {}]   ;;  %s2962_s10 = inlined_call_operand.vmem [shape: f32[1,32], index: 10, kind: input, shape index: {}]   ;;  %s2963_s11 = inlined_call_operand.vmem [shape: f32[1,32], index: 11, kind: input, shape index: {}]   ;;  %s2964_s12 = inlined_call_operand.vmem [shape: f32[1,32], index: 12, kind: input, shape index: {}]   ;;  %s2965_s13 = inlined_call_operand.hbm [shape: f32[2,4,32], index: 13, kind: output, shape index: {0}]   ;;  %s2966_s14 = inlined_call_operand.hbm [shape: bf16[2,16,16], index: 14, kind: output, shape index: {1}]   ;;  %s2967_s15 = inlined_call_operand.hbm [shape: bf16[2,8,8], index: 15, kind: output, shape index: {2}]   ;;  %s2968_s16 = inlined_call_operand.hbm [shape: bf16[2,4,4], index: 16, kind: output, shape index: {3}]  }
   0x1   :  { %2977 = sst [smem:[#allocation16_spill]] %s2952_s0 }
   0x2   :  { %2978 = sst [smem:[#allocation17_spill]] %s2953_s1 }
   0x3   :  { %2979 = sst [smem:[#allocation18_spill]] %s2954_s2 }
   0x4   :  { %2980 = sst [smem:[#allocation19_spill]] %s2955_s3 }
   0x5   :  { %2981 = sst [smem:[#allocation20_spill]] %s2956_s4 }
   0x6   :  { %2982 = sst [smem:[#allocation21_spill]] %s2957_s5 }
   0x7   :  { %2983 = sst [smem:[#allocation22_spill]] %s2958_s6 }
   0x8   :  { %2984 = sst [smem:[#allocation23_spill]] %s2959_s7 }
   0x9   :  { %2985 = sst [smem:[#allocation24_spill]] %s2960_s8 }
   0xa   :  { %2986 = sst [smem:[#allocation25_spill]] %s2961_s9 }
   0xb   :  { %2987 = sst [smem:[#allocation26_spill]] %s2962_s10 }
   0xc   :  { %22 = vsyncpa [#allocation5], 0 }
   0xd   :  { %24 = vsyncpa [#allocation5 + $0x1], 0 }
   0xe   :  { %25 = vsyncpa [#allocation7], 0 }
   0xf   :  { %27 = vsyncpa [#allocation7 + $0x1], 0 }
  0x10   :  { %28 = vsyncpa [#allocation10], 0 }
  0x11   :  { %30 = vsyncpa [#allocation10 + $0x1], 0  ;;  %s2512_s21 = smov 0   ;;  %s2514_s22 = smov 0  }
  0x12   :  { %s2516_s23 = smov 0   ;;  %s2518_s24 = smov 0  }
  0x13 LB: > { %2988 = sst [smem:[#allocation14_spill]] %s2410_s23  ;;  %s2533_s25 = sadd.s32 4294967295, %s2414_s24   ;;  %s2414_s24 = sphi %s2518_s24, %s3012_s24   ;;  %s2410_s23 = sphi %s2516_s23, %s3009_s23   ;;  %s2406_s22 = sphi %s2514_s22, %s3011_s22   ;;  %s2402_s21 = sphi %s2512_s21, %s3010_s21  }
  0x14   : > { %s2969_s26 = sadd.s32 4294967294, %s2414_s24   ;;  %s2537_s27 = sadd.s32 1, %s2414_s24  }
  0x15   : > { %s321_s28 = sadd.s32 1, %s2410_s23  ;;  %s318_s29 = ssub.s32 %s2414_s24, %s2537_s27 }
  0x16   : > { %p331_p0 = scmp.ne.s32.totalorder %s2410_s23, %s2406_s22  ;;  %p319_p1 = scmp.eq.s32.totalorder %s318_s29, 0 }
  0x17   : > { %p332_p2 = scmp.eq.s32.totalorder %s2533_s25, 1  ;;  %p337_p3 = scmp.ne.s32.totalorder %s2406_s22, %s2402_s21 }
  0x18   : > { %p338_p4 = scmp.eq.s32.totalorder %s2969_s26, 1  ;;  %p1913_p7 = scmp.ge.s32.totalorder %s2414_s24, 1 }
  0x19   : > { %s2550_s30 = scalar_select %p319_p1, %s2410_s23, %s321_s28  }
  0x1a   : > { %p2552_p5 = por %p332_p2, %p331_p0  ;;  %p2556_p6 = por %p338_p4, %p337_p3 }
  0x1b   : > { %2989 = sst [smem:[#allocation15_spill]] %s2550_s30  ;;  %p478_p8 = scmp.lt.s32.totalorder %s2414_s24, 3 }
  0x1d   : > { %p479_p9 = pnand %p1913_p7, %p478_p8 }
  0x1e   : > { %s2992_s1 = sld [smem:[#allocation17_spill]] (!%p479_p9)  ;;  %v2416_v1 = vmov (!%p479_p9), 0.0   ;;  %vm2417_vm0 = vmmov (!%p479_p9), 0   ;;  %p543_p10 = scmp.lt.s32.totalorder (!%p479_p9), %s2533_s25, 1  ;;  %vm572_vm1 = vcmask (!%p479_p9), 261120   ;;  %vm706_vm2 = vcmask (!%p479_p9), 130048  }
  0x1f   : > { %482 = sbr.rel (%p479_p9) target bundleno = 5421 (0x152d), region = 72  ;;  %2029 = vmatprep.subr.bf16.mxu0 (!%p479_p9), %v2416_v1  ;;  %2037 = vmatprep.subr.bf16.mxu1 (!%p479_p9), %v2416_v1  ;;  %s2993_s30 = sld [smem:[#allocation16_spill]] (!%p479_p9)  ;;  %vm842_vm3 = vcmask (!%p479_p9), 125952   ;;  %vm860_vm4 = vcmask (!%p479_p9), 253952   ;;  %v2420_v55 = vmov (!%p479_p9), -1e+30  }
  0x20   : > { %2033 = vmatprep.mubr.msk.bf16.mxu0 (!%p479_p9), %vm2417_vm0, %v2416_v1  ;;  %2041 = vmatprep.mubr.msk.bf16.mxu1 (!%p479_p9), %vm2417_vm0, %v2416_v1  ;;  %s2971_s20 = smov (!%p479_p9), 96   ;;  %s2994_s2 = sld [smem:[#allocation18_spill]] (!%p479_p9)  ;;  %861 = vst.msk [vmem:[#allocation2 + $0x1] sm:$0x1] (!%p479_p9), %vm860_vm4, %v2416_v1  ;;  %984 = vst.msk [vmem:[#allocation3] sm:$0x1] (!%p479_p9), %vm860_vm4, %v2420_v55 }
  0x21   : > { %s2607_s28 = sand.u32 (!%p479_p9), 1, %s2406_s22   ;;  %s2995_s7 = sld [smem:[#allocation23_spill]] (!%p479_p9)  ;;  %vm870_vm5 = vcmask (!%p479_p9), 523520   ;;  %vm882_vm6 = vcmask (!%p479_p9), 778752   ;;  %vm879_vm7 = vcmask (!%p479_p9), 785920   ;;  %vm929_vm8 = vcmask (!%p479_p9), 785408  }
  0x22   : > { %s2997_s3 = sld [smem:[#allocation19_spill]] (!%p479_p9)  ;;  %s2998_s8 = sld [smem:[#allocation24_spill]] (!%p479_p9)  ;;  %vm1141_vm11 = vcmask (!%p479_p9), 64512   ;;  %vm1160_vm12 = vcmask (!%p479_p9), 1043456   ;;  %vm1260_vm13 = vcmask (!%p479_p9), 60416   ;;  %vm1533_vm15 = vcmask (!%p479_p9), 27648  }
  0x23   : > { %s3000_s4 = sld [smem:[#allocation20_spill]] (!%p479_p9)  ;;  %s3001_s9 = sld [smem:[#allocation25_spill]] (!%p479_p9) }
  0x24   : > { %v2212_v0 = vld [vmem:[%s2992_s1] sm:$0xff] (!%p479_p9)   ;;  %v2213_v2 = vld [vmem:[%s2992_s1 + $0x8] sm:$0xff] (!%p479_p9)   ;;  %s2996_s1 = smov (!%p479_p9), 64   ;;  %s3003_s5 = sld [smem:[#allocation21_spill]] (!%p479_p9) }
  0x25   : > { %2030 = vmatpush3.bf16.msra.mxu0 (!%p479_p9), %v2212_v0  ;;  %s3004_s10 = sld [smem:[#allocation26_spill]] (!%p479_p9)  ;;  %s3005_s6 = sld [smem:[#allocation22_spill]] (!%p479_p9) }
  0x26   : > { %2031 = vmatprep.subr.bf16.mxu0 %v2416_v1  ;;  %s544_s29 = scalar_select %p543_p10, %s2533_s25, 1  ;;  %v2214_v37 = vld [vmem:[%s2994_s2] sm:$0xff]   ;;  %v2215_v48 = vld [vmem:[%s2994_s2 + $0x8] sm:$0xff]  }
  0x27   : > { %v2216_v54 = vld [vmem:[%s2995_s7] sm:$0xff]   ;;  %v2217_v56 = vld [vmem:[%s2995_s7 + $0x8] sm:$0xff]   ;;  %v2218_v57 = vld [vmem:[%s2995_s7 + $0x10] sm:$0xff]   ;;  %s2999_s2 = smov 96  }
  0x28   : > { %s1978_s18 = sshll.u32 %s544_s29, 4  ;;  %s1915_s29 = sshll.u32 %s2607_s28, 3  ;;  %v2219_v58 = vld [vmem:[%s2995_s7 + $0x18] sm:$0xff]   ;;  %v2220_v59 = vld [vmem:[%s2995_s7 + $0x20] sm:$0xff]   ;;  %v2221_v60 = vld [vmem:[%s2995_s7 + $0x28] sm:$0xff]  }
  0x29   : > { %2032 = vmatpush3.bf16.msra.mxu0 %v2213_v2  ;;  %s547_s23 = scalar_lea.vmem %s2993_s30, %s1978_s18  ;;  %s2611_s18 = scalar_lea.vmem [#allocation6], %s1915_s29 }
  0x2a   : > { %2045 = vmatprep.subr.bf16.mxu0 %v2416_v1  ;;  %v2581_v3 = vld [vmem:[%s547_s23] sm:$0xff]  ;;  %v2583_v4 = vld [vmem:[%s547_s23 + $0x8] sm:$0xff]  ;;  %s2973_s23 = smov 64   ;;  %s2975_s29 = sshll.u32 %s2607_s28, 2 }
  0x2b   : > { %v559_v5 = vpack.c.bf16 %v2583_v4, %v2581_v3  ;;  %s2712_s19 = scalar_lea.vmem [#allocation8], %s2975_s29  ;;  %s1729_s30 = sshll.u32 %s2611_s18, 4  ;;  %s2812_s30 = int_to_ptr.vmem [resolvable:$true] %s1729_s30 }
  0x2d   : > { %2034 = vmatmul.mubr.msk.bf16.vlgmr.msra.gmra.mrb[0].mxu0 %vm572_vm1, %v559_v5 }
  0x2e   : > { %2047 = vmatprep.mubr.msk.bf16.mxu0 %vm2417_vm0, %v2416_v1 }
 0x100   : > { %v610_v6 = vpop.f32.mrb[0].mxu0 }
 0x101   : > { %620 = vrot.lane.b32.xlu0 %v610_v6, %s2971_s20  ;;  %v2035_v7 = vpop.f32.mrb[1].mxu0 }
 0x102   : > { %v613_v8 = vpop.f32.mrb[2].mxu0 }
 0x103   : > { %v617_v9 = vpack.c.bf16 %v613_v8, %v610_v6  ;;  %v2036_v10 = vpop.f32.mrb[3].mxu0 }
 0x105   : > { %622 = vrot.lane.b32.xlu0 %v613_v8, %s2971_s20  ;;  %s2976_s20 = smov 32  }
 0x173   : > { %v621_v11 = vpop.permute.xlu0 %620 }
 0x174   : > { %626 = vxpose.xlu1.b32.start [1/2] (short) (narrow) %v621_v11, 32  ;;  %v2222_v11 = vld [vmem:[%s2997_s3] sm:$0xff]  }
 0x177   : > { %v623_v12 = vpop.permute.xlu0 %622 }
 0x178   : > { %627 = vxpose.xlu1.b32.end [2/2] (short) (narrow) %v623_v12, 32  ;;  %v2223_v12 = vld [vmem:[%s2997_s3 + $0x8] sm:$0xff]   ;;  %s1981_s3 = sshll.u32 %s2533_s25, 7 }
 0x1f4   : > { %v642_v13 = vpop.trf.xlu1 }
 0x1f8   : > { %v643_v14 = vpop.trf.xlu1 }
 0x1f9   : > { %v658_v15 = vpack.c.bf16 %v643_v14, %v642_v13  ;;  %v1930_v13 = vld [vmem:[%s2998_s8] ss:$0 sm:$0xff] }
 0x1fb   : > { %2038 = vmatpush3.bf16.msra.mxu1 %v658_v15 }
 0x1fc   : > { %v644_v16 = vpop.trf.xlu1  ;;  %2039 = vmatprep.subr.bf16.mxu1 %v2416_v1 }
 0x200   : > { %v645_v17 = vpop.trf.xlu1 }
 0x201   : > { %v659_v18 = vpack.c.bf16 %v645_v17, %v644_v16 }
 0x203   : > { %2040 = vmatpush3.bf16.msra.mxu1 %v659_v18 }
 0x204   : > { %2051 = vmatprep.subr.bf16.mxu1 %v2416_v1 }
 0x206   : > { %2042 = vmatmul.mubr.msk.bf16.vlgmr.msra.gmra.mrb[0].mxu1 %vm572_vm1, %v617_v9 }
 0x207   : > { %2055 = vmatprep.mubr.msk.bf16.mxu1 %vm2417_vm0, %v2416_v1  ;;  %2052 = vmatpush3.bf16.msra.mxu1 %v2214_v37 }
 0x208   : > { %2053 = vmatprep.subr.bf16.mxu1 %v2416_v1 }
 0x20b   : > { %2054 = vmatpush3.bf16.msra.mxu1 %v2215_v48 }
 0x20c   : > { %2075 = vmatprep.subr.bf16.mxu1 %v2416_v1 }
 0x2d9   : > { %v697_v19 = vpop.f32.mrb[0].mxu1 }
 0x2da   : > { %v704_v20 = vmul.f32 0.17677669, %v697_v19  ;;  %v2043_v21 = vpop.f32.mrb[1].mxu1 }
 0x2db   : > { %v700_v22 = vpop.f32.mrb[2].mxu1 }
 0x2dc   : > { %v705_v23 = vmul.f32 0.17677669, %v700_v22  ;;  %v2044_v24 = vpop.f32.mrb[3].mxu1  ;;  %v707_v25 = vsel %vm706_vm2, %v704_v20, -inf }
 0x2dd   : > { %708 = vmax.xlane.f32.xlu0 %v707_v25 }
 0x2de   : > { %v710_v26 = vsel %vm706_vm2, %v705_v23, -inf }
 0x2df   : > { %711 = vmax.xlane.f32.xlu1 %v710_v26 }
 0x36a   : > { %v709_v27 = vpop.xlane.xlu0 %708 }
 0x36b   : > { %v713_v28 = vsub.f32 %v704_v20, %v709_v27 }
 0x36c   : > { %v712_v29 = vpop.xlane.xlu1 %711 }
 0x36d   : > { %v715_v30 = vmul.f32 1.442695, %v713_v28  ;;  %v714_v31 = vsub.f32 %v705_v23, %v712_v29 }
 0x36f   : > { %2236 = vpow2.f32 %v715_v30  ;;  %v717_v32 = vmul.f32 1.442695, %v714_v31 }
 0x371   : > { %2238 = vpow2.f32 %v717_v32 }
 0x379   : > { %v2237_v33 = vpop.eup %2236 }
 0x37a   : > { %v719_v34 = vsel %vm706_vm2, %v2237_v33, 0.0 }
 0x37b   : > { %v2239_v35 = vpop.eup %2238  ;;  %720 = vadd.xlane.f32.xlu0 %v719_v34 }
 0x37c   : > { %v722_v36 = vsel %vm706_vm2, %v2239_v35, 0.0 }
 0x37f   : > { %723 = vadd.xlane.f32.xlu0 %v722_v36 }
 0x395   : > { %731 = vrot.lane.b32.xlu0 %v617_v9, %s2973_s23  ;;  %s1692_s23 = sand.u32 1, %s2533_s25  }
 0x396   : > { %s2814_s26 = scalar_lea.sflag [#allocation7], %s1692_s23 }
 0x408   : > { %v721_v38 = vpop.xlane.xlu0 %720 }
 0x409   : > { %2240 = vrcp.f32 %v721_v38 }
 0x40c   : > { %v724_v39 = vpop.xlane.xlu0 %723 }
 0x40d   : > { %2242 = vrcp.f32 %v724_v39 }
 0x410   : > { %v732_v40 = vpop.permute.xlu0 %731 }
 0x411   : > { %2046 = vmatpush3.bf16.msra.mxu0 %v732_v40 }
 0x412   : > { %2059 = vmatprep.subr.bf16.mxu0 %v2416_v1 }
 0x413   : > { %v2241_v41 = vpop.eup %2240 }
 0x414   : > { %v727_v42 = vmul.f32 %v2241_v41, %v2237_v33 }
 0x416   : > { %v1979_v43 = vpack.c.bf16 %v727_v42, %v727_v42 }
 0x417   : > { %v2243_v44 = vpop.eup %2242 }
 0x418   : > { %v728_v45 = vmul.f32 %v2243_v44, %v2239_v35  ;;  %843 = vst.msk [vmem:[%s2611_s18] sm:$0xf] %vm842_vm3, %v1979_v43 }
 0x41a   : > { %v1980_v46 = vpack.c.bf16 %v728_v45, %v728_v45  ;;  %v729_v47 = vpack.c.bf16 %v728_v45, %v727_v42 }
 0x41c   : > { %2048 = vmatmul.mubr.msk.bf16.vlgmr.msra.gmra.mrb[4].mxu0 %vm706_vm2, %v729_v47  ;;  %844 = vst.msk [vmem:[%s2611_s18 + $0x4] sm:$0xf] %vm842_vm3, %v1980_v46  ;;  %vm1549_vm2 = vcmask 31744   ;;  %vm1653_vm3 = vcmask 25600  }
 0x41d   : > { %2071 = vmatprep.mubr.msk.bf16.mxu0 %vm2417_vm0, %v2416_v1  ;;  %2060 = vmatpush3.bf16.msra.mxu0 %v2216_v54 }
 0x41e   : > { %2061 = vmatprep.subr.bf16.mxu0 %v2416_v1 }
 0x421   : > { %2062 = vmatpush3.bf16.msra.mxu0 %v2217_v56 }
 0x422   : > { %2063 = vmatprep.subr.bf16.mxu0 %v2416_v1 }
 0x425   : > { %2064 = vmatpush3.bf16.msra.mxu0 %v2218_v57 }
 0x426   : > { %2065 = vmatprep.subr.bf16.mxu0 %v2416_v1 }
 0x429   : > { %2066 = vmatpush3.bf16.msra.mxu0 %v2219_v58 }
 0x42a   : > { %2067 = vmatprep.subr.bf16.mxu0 %v2416_v1 }
 0x42d   : > { %2068 = vmatpush3.bf16.msra.mxu0 %v2220_v59  ;;  %v2224_v59 = vld [vmem:[%s3000_s4] sm:$0xff]  }
 0x42e   : > { %2069 = vmatprep.subr.bf16.mxu0 %v2416_v1 }
 0x431   : > { %2070 = vmatpush3.bf16.msra.mxu0 %v2221_v60 }
 0x432   : > { %2097 = vmatprep.subr.bf16.mxu0 %v2416_v1 }
 0x4ef   : > { %v771_v49 = vpop.f32.mrb[4].mxu0 }
 0x4f0   : > { %v2049_v50 = vpop.f32.mrb[5].mxu0 }
 0x4f1   : > { %v774_v51 = vpop.f32.mrb[6].mxu0 }
 0x4f2   : > { %v778_v52 = vpack.c.bf16 %v774_v51, %v771_v49  ;;  %v2050_v53 = vpop.f32.mrb[7].mxu0 }
 0x4f4   : > { %2056 = vmatmul.mubr.msk.bf16.vlgmr.msra.gmra.mrb[4].mxu1 %vm572_vm1, %v778_v52 }
 0x4f5   : > { %2079 = vmatprep.mubr.msk.bf16.mxu1 %vm2417_vm0, %v2416_v1  ;;  %2076 = vmatpush3.bf16.msra.mxu1 %v2222_v11  ;;  %v2230_v11 = vld [vmem:[%s3001_s9 + $0x20] sm:$0xff]  }
 0x4f6   : > { %2077 = vmatprep.subr.bf16.mxu1 %v2416_v1 }
 0x4f9   : > { %2078 = vmatpush3.bf16.msra.mxu1 %v2223_v12  ;;  %v2231_v12 = vld [vmem:[%s3001_s9 + $0x28] sm:$0xff]  }
 0x4fa   : > { %2083 = vmatprep.subr.bf16.mxu1 %v2416_v1 }
 0x5c7   : > { %v828_v61 = vpop.f32.mrb[4].mxu1 }
 0x5c8   : > { %v829_v62 = vadd.f32 %v828_v61, %v2581_v3  ;;  %v2057_v63 = vpop.f32.mrb[5].mxu1 }
 0x5c9   : > { %v831_v0 = vpop.f32.mrb[6].mxu1 }
 0x5ca   : > { %858 = vst.msk [vmem:[#allocation2 + $0x2] sm:$0xff] %vm572_vm1, %v829_v62  ;;  %v832_v2 = vadd.f32 %v831_v0, %v2583_v4  ;;  %864 = vrot.lane.b32.xlu1 %v829_v62, %s2976_s20  ;;  %v2058_v5 = vpop.f32.mrb[7].mxu1  ;;  %v2225_v0 = vld [vmem:[%s3000_s4 + $0x8] sm:$0xff]   ;;  %s3002_s4 = smov 32  }
 0x5cc   : > { %859 = vst.msk [vmem:[#allocation2 + $0xa] sm:$0xff] %vm572_vm1, %v832_v2  ;;  %866 = vrot.lane.b32.xlu0 %v832_v2, %s2976_s20  ;;  %s1917_s20 = sshll.u32 %s2607_s28, 1 }
 0x5cd   : > { %s2790_s29 = scalar_lea.vmem [#allocation9], %s1917_s20  ;;  %s2809_s20 = scalar_lea.hbm %s2966_s14, %s1981_s3 }
 0x5ce   : > { %873 = vrot.lane.b32.xlu1 %v829_v62, %s2996_s1 }
 0x5d0   : > { %875 = vrot.lane.b32.xlu0 %v832_v2, %s2996_s1 }
 0x63c   : > { %v865_v3 = vpop.permute.xlu1 %864 }
 0x63d   : > { %871 = vst.msk [vmem:[#allocation2 + $0x1] sm:$0xff] %vm870_vm5, %v865_v3 }
 0x63e   : > { %v867_v4 = vpop.permute.xlu0 %866 }
 0x63f   : > { %872 = vst.msk [vmem:[#allocation2 + $0x9] sm:$0xff] %vm870_vm5, %v867_v4 }
 0x640   : > { %883 = vst.msk [vmem:[#allocation2 + $0x10] sm:$0x1] %vm882_vm6, %v2416_v1  ;;  %v874_v6 = vpop.permute.xlu1 %873 }
 0x641   : > { %880 = vst.msk [vmem:[#allocation2] sm:$0xff] %vm879_vm7, %v874_v6 }
 0x642   : > { %v876_v7 = vpop.permute.xlu0 %875 }
 0x643   : > { %881 = vst.msk [vmem:[#allocation2 + $0x8] sm:$0xff] %vm879_vm7, %v876_v7  ;;  %v2226_v7 = vld [vmem:[%s3001_s9] sm:$0xff]  }
 0x64a   : > { %v884_v8 = vld [vmem:[#allocation2 + $0x1] sm:$0xff]  ;;  %v885_v9 = vld [vmem:[#allocation2 + $0x9] sm:$0xff] }
 0x64b   : > { %v886_v10 = vpack.c.bf16 %v885_v9, %v884_v8  ;;  %1276 = vst.msk [vmem:[#allocation2 + $0x1] sm:$0x1] %vm860_vm4, %v2416_v1  ;;  %v2227_v8 = vld [vmem:[%s3001_s9 + $0x8] sm:$0xff]   ;;  %v2228_v9 = vld [vmem:[%s3001_s9 + $0x10] sm:$0xff]  }
 0x64d   : > { %2072 = vmatmul.mubr.msk.bf16.vlgmr.msra.gmra.mrb[8].mxu0 %vm929_vm8, %v886_v10  ;;  %v2229_v10 = vld [vmem:[%s3001_s9 + $0x18] sm:$0xff]  }
 0x64e   : > { %2101 = vmatprep.mubr.msk.bf16.mxu0 %vm2417_vm0, %v2416_v1  ;;  %2098 = vmatpush3.bf16.msra.mxu0 %v2224_v59 }
 0x64f   : > { %2099 = vmatprep.subr.bf16.mxu0 %v2416_v1 }
 0x652   : > { %2100 = vmatpush3.bf16.msra.mxu0 %v2225_v0 }
 0x653   : > { %2121 = vmatprep.subr.bf16.mxu0 %v2416_v1 }
 0x720   : > { %v967_v14 = vpop.f32.mrb[8].mxu0 }
 0x721   : > { %v968_v15 = vadd.f32 %v1930_v13, %v967_v14  ;;  %v2073_v16 = vpop.f32.mrb[9].mxu0 }
 0x722   : > { %v970_v17 = vpop.f32.mrb[10].mxu0 }
 0x723   : > { %v976_v18 = vmul.f32 1.442695, %v968_v15  ;;  %v971_v19 = vadd.f32 %v1930_v13, %v970_v17  ;;  %v2074_v20 = vpop.f32.mrb[11].mxu0  ;;  %vm974_vm9 = vcmp.gt.f32.partialorder %v968_v15, 0.0 }
 0x725   : > { %2244 = vpow2.f32 %v976_v18  ;;  %v978_v21 = vmul.f32 1.442695, %v971_v19  ;;  %vm975_vm10 = vcmp.gt.f32.partialorder %v971_v19, 0.0 }
 0x727   : > { %2246 = vpow2.f32 %v978_v21 }
 0x72f   : > { %v2245_v22 = vpop.eup %2244 }
 0x730   : > { %v1938_v23 = vadd.f32 -1.0, %v2245_v22  ;;  %v2232_v22 = vld [vmem:[%s3003_s5] sm:$0xff]  }
 0x731   : > { %v2247_v24 = vpop.eup %2246 }
 0x732   : > { %v982_v25 = vsel %vm974_vm9, %v968_v15, %v1938_v23  ;;  %v1939_v26 = vadd.f32 -1.0, %v2247_v24  ;;  %v2233_v23 = vld [vmem:[%s3003_s5 + $0x8] sm:$0xff]   ;;  %v1948_v24 = vld [vmem:[%s3004_s10] ss:$0 sm:$0xff]  ;;  %s2260_s5 = scalar_lea.vmem %s2812_s30, 128 }
 0x733   : > { %985 = vst.msk [vmem:[#allocation3 + $0x1] sm:$0xff] %vm572_vm1, %v982_v25  ;;  %p2261_p11 = scmp.ne.s32.totalorder %s2812_s30, %s2260_s5 }
 0x734   : > { %v983_v27 = vsel %vm975_vm10, %v971_v19, %v1939_v26 }
 0x735   : > { %986 = vst.msk [vmem:[#allocation3 + $0x9] sm:$0xff] %vm572_vm1, %v983_v27  ;;  %p2262_p12 = pnand %p2261_p11, %p2552_p5 }
 0x737   : > { %p2263_p13 = pneg %p2262_p12 }
 0x73c   : > { %v987_v28 = vld [vmem:[#allocation3] ss:$2 sm:$0xff]  ;;  %v989_v29 = vld [vmem:[#allocation3 + $0x1] ss:$2 sm:$0xff] }
 0x73d   : > { %v992_v30 = vmax.f32 %v987_v28, %v989_v29  ;;  %1379 = vst.msk [vmem:[#allocation3] sm:$0x1] %vm860_vm4, %v2420_v55  ;;  %v991_v31 = vld [vmem:[#allocation3 + $0x2] ss:$2 sm:$0xff]  ;;  %vm1657_vm4 = vcmask 257024  }
 0x73f   : > { %v2687_v32 = vmax.f32 %v992_v30, %v991_v31 }
 0x741   : > { %v1002_v33 = vpack.c.bf16 %v2687_v32, %v2687_v32 }
 0x743   : > { %2080 = vmatmul.mubr.msk.bf16.vlgmr.msra.gmra.mrb[8].mxu1 %vm572_vm1, %v1002_v33 }
 0x744   : > { %2087 = vmatprep.mubr.msk.bf16.mxu1 %vm2417_vm0, %v2416_v1 }
 0x816   : > { %v1052_v34 = vpop.f32.mrb[8].mxu1 }
 0x817   : > { %1060 = vrot.lane.b32.xlu1 %v1052_v34, %s2999_s2  ;;  %v2081_v35 = vpop.f32.mrb[9].mxu1  ;;  %v1058_v45 = vpack.c.bf16 %v1052_v34, %v1052_v34 }
 0x818   : > { %v1055_v36 = vpop.f32.mrb[10].mxu1 }
 0x819   : > { %v2082_v37 = vpop.f32.mrb[11].mxu1 }
 0x889   : > { %v1061_v38 = vpop.permute.xlu1 %1060 }
 0x88a   : > { %1063 = vxpose.xlu0.b32.start.end [1/1] (short) (narrow) %v1061_v38, 32 }
 0x90a   : > { %v1079_v39 = vpop.trf.xlu0 }
 0x90e   : > { %v1080_v40 = vpop.trf.xlu0 }
 0x90f   : > { %v1095_v41 = vpack.c.bf16 %v1080_v40, %v1079_v39 }
 0x911   : > { %2084 = vmatpush3.bf16.msra.mxu1 %v1095_v41 }
 0x912   : > { %v1081_v42 = vpop.trf.xlu0  ;;  %2085 = vmatprep.subr.bf16.mxu1 %v2416_v1 }
 0x916   : > { %v1082_v43 = vpop.trf.xlu0 }
 0x917   : > { %v1096_v44 = vpack.c.bf16 %v1082_v43, %v1081_v42 }
 0x919   : > { %2086 = vmatpush3.bf16.msra.mxu1 %v1096_v44 }
 0x91a   : > { %2091 = vmatprep.subr.bf16.mxu1 %v2416_v1 }
 0x91c   : > { %2088 = vmatmul.mubr.msk.bf16.vlgmr.msra.gmra.mrb[12].mxu1 %vm572_vm1, %v1058_v45 }
 0x91d   : > { %2093 = vmatprep.mubr.msk.bf16.mxu1 %vm2417_vm0, %v2416_v1 }
 0x9ef   : > { %v1134_v46 = vpop.f32.mrb[12].mxu1 }
 0x9f0   : > { %v1140_v47 = vmul.f32 0.17677669, %v1134_v46  ;;  %v2089_v48 = vpop.f32.mrb[13].mxu1 }
 0x9f1   : > { %v1137_v49 = vpop.f32.mrb[14].mxu1 }
 0x9f2   : > { %v2090_v50 = vpop.f32.mrb[15].mxu1  ;;  %v1142_v51 = vsel %vm1141_vm11, %v1140_v47, -inf }
 0x9f3   : > { %1143 = vmax.xlane.f32.xlu1 %v1142_v51 }
 0xa04   : > { %1155 = vrot.lane.b32.xlu1 %v1058_v45, %s2996_s1 }
 0xa80   : > { %v1144_v52 = vpop.xlane.xlu1 %1143 }
 0xa81   : > { %v1145_v53 = vsub.f32 %v1140_v47, %v1144_v52 }
 0xa83   : > { %v1146_v54 = vmul.f32 1.442695, %v1145_v53 }
 0xa84   : > { %v1156_v55 = vpop.permute.xlu1 %1155 }
 0xa85   : > { %2248 = vpow2.f32 %v1146_v54  ;;  %v1162_v56 = vsel %vm1160_vm12, %v1156_v55, 0 }
 0xa86   : > { %2092 = vmatpush3.bf16.msra.mxu1 %v1162_v56 }
 0xa87   : > { %2105 = vmatprep.subr.bf16.mxu1 %v2416_v1 }
 0xa8f   : > { %v2249_v57 = vpop.eup %2248 }
 0xa90   : > { %v1148_v58 = vsel %vm1141_vm11, %v2249_v57, 0.0 }
 0xa91   : > { %1149 = vadd.xlane.f32.xlu0 %v1148_v58 }
 0xb1e   : > { %v1150_v60 = vpop.xlane.xlu0 %1149 }
 0xb1f   : > { %2250 = vrcp.f32 %v1150_v60 }
 0xb29   : > { %v2251_v61 = vpop.eup %2250 }
 0xb2a   : > { %v1152_v62 = vmul.f32 %v2251_v61, %v2249_v57 }
 0xb2c   : > { %v1153_v63 = vpack.c.bf16 %v1152_v62, %v1152_v62 }
 0xb2e   : > { %2094 = vmatmul.mubr.msk.bf16.vlgmr.msra.gmra.mrb[16].mxu1 %vm1141_vm11, %v1153_v63  ;;  %1261 = vst.msk [vmem:[%s2712_s19] sm:$0xf] %vm1260_vm13, %v1153_v63  ;;  %v2234_v63 = vld [vmem:[%s3005_s6] sm:$0xff]  }
 0xb2f   : > { %2117 = vmatprep.mubr.msk.bf16.mxu1 %vm2417_vm0, %v2416_v1  ;;  %2106 = vmatpush3.bf16.msra.mxu1 %v2226_v7 }
 0xb30   : > { %2107 = vmatprep.subr.bf16.mxu1 %v2416_v1 }
 0xb33   : > { %2108 = vmatpush3.bf16.msra.mxu1 %v2227_v8 }
 0xb34   : > { %2109 = vmatprep.subr.bf16.mxu1 %v2416_v1 }
 0xb37   : > { %2110 = vmatpush3.bf16.msra.mxu1 %v2228_v9 }
 0xb38   : > { %2111 = vmatprep.subr.bf16.mxu1 %v2416_v1 }
 0xb3b   : > { %2112 = vmatpush3.bf16.msra.mxu1 %v2229_v10 }
 0xb3c   : > { %2113 = vmatprep.subr.bf16.mxu1 %v2416_v1 }
 0xb3f   : > { %2114 = vmatpush3.bf16.msra.mxu1 %v2230_v11 }
 0xb40   : > { %2115 = vmatprep.subr.bf16.mxu1 %v2416_v1 }
 0xb43   : > { %2116 = vmatpush3.bf16.msra.mxu1 %v2231_v12 }
 0xb44   : > { %2143 = vmatprep.subr.bf16.mxu1 %v2416_v1 }
 0xc01   : > { %v1198_v2 = vpop.f32.mrb[16].mxu1 }
 0xc02   : > { %v1204_v5 = vpack.c.bf16 %v1198_v2, %v1198_v2  ;;  %v2095_v3 = vpop.f32.mrb[17].mxu1 }
 0xc03   : > { %v1201_v4 = vpop.f32.mrb[18].mxu1 }
 0xc04   : > { %v2096_v6 = vpop.f32.mrb[19].mxu1  ;;  %2102 = vmatmul.mubr.msk.bf16.vlgmr.msra.gmra.mrb[12].mxu0 %vm572_vm1, %v1204_v5 }
 0xc05   : > { %2125 = vmatprep.mubr.msk.bf16.mxu0 %vm2417_vm0, %v2416_v1  ;;  %2122 = vmatpush3.bf16.msra.mxu0 %v2232_v22 }
 0xc06   : > { %2123 = vmatprep.subr.bf16.mxu0 %v2416_v1 }
 0xc09   : > { %2124 = vmatpush3.bf16.msra.mxu0 %v2233_v23 }
 0xc0a   : > { %2129 = vmatprep.subr.bf16.mxu0 %v2416_v1 }
 0xcd7   : > { %v1254_v13 = vpop.f32.mrb[12].mxu0 }
 0xcd8   : > { %v1255_v14 = vadd.f32 %v1254_v13, %v2687_v32  ;;  %v2103_v15 = vpop.f32.mrb[13].mxu0 }
 0xcd9   : > { %v1257_v16 = vpop.f32.mrb[14].mxu0 }
 0xcda   : > { %1275 = vst.msk [vmem:[#allocation2 + $0x2] sm:$0xff] %vm572_vm1, %v1255_v14  ;;  %1278 = vrot.lane.b32.xlu1 %v1255_v14, %s3002_s4  ;;  %v2104_v17 = vpop.f32.mrb[15].mxu0 }
 0xcde   : > { %1282 = vrot.lane.b32.xlu1 %v1255_v14, %s2996_s1 }
 0xd4c   : > { %v1279_v18 = vpop.permute.xlu1 %1278 }
 0xd4d   : > { %1281 = vst.msk [vmem:[#allocation2 + $0x1] sm:$0xff] %vm870_vm5, %v1279_v18 }
 0xd4e   : > { %1286 = vst.msk [vmem:[#allocation2 + $0x8] sm:$0x1] %vm882_vm6, %v2416_v1 }
 0xd50   : > { %v1283_v19 = vpop.permute.xlu1 %1282 }
 0xd51   : > { %1285 = vst.msk [vmem:[#allocation2] sm:$0xff] %vm879_vm7, %v1283_v19 }
 0xd58   : > { %v1287_v20 = vld [vmem:[#allocation2 + $0x1] sm:$0xff] }
 0xd59   : > { %v1288_v21 = vpack.c.bf16 %v1287_v20, %v1287_v20 }
 0xd5b   : > { %2118 = vmatmul.mubr.msk.bf16.vlgmr.msra.gmra.mrb[20].mxu1 %vm929_vm8, %v1288_v21 }
 0xd5c   : > { %2147 = vmatprep.mubr.msk.bf16.mxu1 %vm2417_vm0, %v2416_v1  ;;  %2144 = vmatpush3.bf16.msra.mxu1 %v2234_v63 }
 0xd5d   : > { %2145 = vmatprep.subr.bf16.mxu1 %v2416_v1 }
 0xe2e   : > { %v1368_v25 = vpop.f32.mrb[20].mxu1 }
 0xe2f   : > { %v1369_v26 = vadd.f32 %v1948_v24, %v1368_v25  ;;  %v2119_v27 = vpop.f32.mrb[21].mxu1 }
 0xe30   : > { %v1371_v28 = vpop.f32.mrb[22].mxu1 }
 0xe31   : > { %v1375_v29 = vmul.f32 1.442695, %v1369_v26  ;;  %v2120_v30 = vpop.f32.mrb[23].mxu1  ;;  %vm1374_vm14 = vcmp.gt.f32.partialorder %v1369_v26, 0.0 }
 0xe33   : > { %2252 = vpow2.f32 %v1375_v29 }
 0xe3d   : > { %v2253_v31 = vpop.eup %2252 }
 0xe3e   : > { %v1956_v32 = vadd.f32 -1.0, %v2253_v31 }
 0xe40   : > { %v1378_v33 = vsel %vm1374_vm14, %v1369_v26, %v1956_v32 }
 0xe41   : > { %1380 = vst.msk [vmem:[#allocation3 + $0x1] sm:$0xff] %vm572_vm1, %v1378_v33 }
 0xe48   : > { %v1381_v34 = vld [vmem:[#allocation3] ss:$2 sm:$0xf]  ;;  %v1382_v35 = vld [vmem:[#allocation3 + $0x1] ss:$2 sm:$0xf] }
 0xe49   : > { %v1384_v36 = vmax.f32 %v1381_v34, %v1382_v35  ;;  %v1383_v37 = vld [vmem:[#allocation3 + $0x2] ss:$2 sm:$0xf] }
 0xe4b   : > { %v2771_v38 = vmax.f32 %v1384_v36, %v1383_v37 }
 0xe4d   : > { %v1394_v39 = vpack.c.bf16 %v2771_v38, %v2771_v38 }
 0xe4f   : > { %2126 = vmatmul.mubr.msk.bf16.vlgmr.msra.gmra.mrb[16].mxu0 %vm572_vm1, %v1394_v39 }
 0xe50   : > { %2133 = vmatprep.mubr.msk.bf16.mxu0 %vm2417_vm0, %v2416_v1 }
 0xf22   : > { %v1444_v40 = vpop.f32.mrb[16].mxu0 }
 0xf23   : > { %1452 = vrot.lane.b32.xlu1 %v1444_v40, %s2999_s2  ;;  %v2127_v41 = vpop.f32.mrb[17].mxu0  ;;  %v1450_v51 = vpack.c.bf16 %v1444_v40, %v1444_v40 }
 0xf24   : > { %v1447_v42 = vpop.f32.mrb[18].mxu0 }
 0xf25   : > { %v2128_v43 = vpop.f32.mrb[19].mxu0 }
 0xf95   : > { %v1453_v44 = vpop.permute.xlu1 %1452 }
 0xf96   : > { %1455 = vxpose.xlu1.b32.start.end [1/1] (short) (narrow) %v1453_v44, 32 }
0x1016   : > { %v1471_v45 = vpop.trf.xlu1 }
0x101a   : > { %v1472_v46 = vpop.trf.xlu1 }
0x101b   : > { %v1487_v47 = vpack.c.bf16 %v1472_v46, %v1471_v45 }
0x101d   : > { %2130 = vmatpush3.bf16.msra.mxu0 %v1487_v47 }
0x101e   : > { %v1473_v48 = vpop.trf.xlu1  ;;  %2131 = vmatprep.subr.bf16.mxu0 %v2416_v1 }
0x1022   : > { %v1474_v49 = vpop.trf.xlu1 }
0x1023   : > { %v1488_v50 = vpack.c.bf16 %v1474_v49, %v1473_v48 }
0x1025   : > { %2132 = vmatpush3.bf16.msra.mxu0 %v1488_v50 }
0x1026   : > { %2137 = vmatprep.subr.bf16.mxu0 %v2416_v1 }
0x1028   : > { %2134 = vmatmul.mubr.msk.bf16.vlgmr.msra.gmra.mrb[20].mxu0 %vm572_vm1, %v1450_v51 }
0x1029   : > { %2139 = vmatprep.mubr.msk.bf16.mxu0 %vm2417_vm0, %v2416_v1  ;;  %vm1553_vm0 = vcmask 1041408   ;;  %v2235_v1 = vld [vmem:[%s3005_s6 + $0x8] sm:$0xff]   ;;  %s2422_s6 = smov [#allocation6]  }
0x102a   : > { %2146 = vmatpush3.bf16.msra.mxu1 %v2235_v1  ;;  %s2264_s7 = sshll.u32 %s2422_s6, 4  ;;  %s2265_s7 = int_to_ptr.vmem [resolvable:$false] %s2264_s7 }
0x102b   : > { %s2266_s8 = scalar_lea.vmem %s2265_s7, 256  ;;  %p2267_p0 = scmp.lt.s32.totalorder %s2812_s30, %s2265_s7 }
0x102c   : > { %p2268_p1 = scmp.lt.s32.totalorder %s2266_s8, %s2260_s5 }
0x102e   : > { %p2269_p2 = por %p2268_p1, %p2267_p0 }
0x1030   : > { %p2270_p3 = pnand %p2269_p2, %p2263_p13 }
0x10fb   : > { %v1526_v52 = vpop.f32.mrb[20].mxu0 }
0x10fc   : > { %v1532_v53 = vmul.f32 0.17677669, %v1526_v52  ;;  %v2135_v54 = vpop.f32.mrb[21].mxu0 }
0x10fd   : > { %v1529_v55 = vpop.f32.mrb[22].mxu0 }
0x10fe   : > { %v2136_v56 = vpop.f32.mrb[23].mxu0  ;;  %v1534_v57 = vsel %vm1533_vm15, %v1532_v53, -inf }
0x10ff   : > { %1535 = vmax.xlane.f32.xlu0 %v1534_v57 }
0x118c   : > { %v1536_v58 = vpop.xlane.xlu0 %1535 }
0x118d   : > { %v1537_v59 = vsub.f32 %v1532_v53, %v1536_v58 }
0x118f   : > { %v1538_v60 = vmul.f32 1.442695, %v1537_v59 }
0x1191   : > { %2254 = vpow2.f32 %v1538_v60 }
0x119b   : > { %v2255_v61 = vpop.eup %2254 }
0x119c   : > { %v1540_v62 = vsel %vm1533_vm15, %v2255_v61, 0.0 }
0x119d   : > { %1541 = vadd.xlane.f32.xlu0 %v1540_v62 }
0x11b3   : > { %1547 = vrot.lane.b32.xlu0 %v1450_v51, %s2996_s1 }
0x122a   : > { %v1542_v0 = vpop.xlane.xlu0 %1541 }
0x122b   : > { %2256 = vrcp.f32 %v1542_v0 }
0x122e   : > { %v1548_v2 = vpop.permute.xlu0 %1547 }
0x122f   : > { %v1555_v5 = vsel %vm1553_vm0, %v1548_v2, 0 }
0x1230   : > { %2138 = vmatpush3.bf16.msra.mxu0 %v1555_v5 }
0x1235   : > { %v2257_v3 = vpop.eup %2256 }
0x1236   : > { %v1544_v4 = vmul.f32 %v2257_v3, %v2255_v61 }
0x1238   : > { %v1545_v6 = vpack.c.bf16 %v1544_v4, %v1544_v4 }
0x123a   : > { %2140 = vmatmul.mubr.msk.bf16.vlgmr.msra.gmra.mrb[24].mxu0 %vm1549_vm2, %v1545_v6  ;;  %1654 = vst.msk [vmem:[%s2790_s29] sm:$0x3] %vm1653_vm3, %v1545_v6 }
0x130d   : > { %v1591_v7 = vpop.f32.mrb[24].mxu0 }
0x130e   : > { %v1597_v8 = vpack.c.bf16 %v1591_v7, %v1591_v7  ;;  %v2141_v9 = vpop.f32.mrb[25].mxu0 }
0x130f   : > { %v1594_v10 = vpop.f32.mrb[26].mxu0 }
0x1310   : > { %v2142_v11 = vpop.f32.mrb[27].mxu0  ;;  %2148 = vmatmul.mubr.msk.bf16.vlgmr.msra.gmra.mrb[24].mxu1 %vm572_vm1, %v1597_v8 }
0x13e3   : > { %v1647_v12 = vpop.f32.mrb[24].mxu1 }
0x13e4   : > { %v1648_v13 = vadd.f32 %v1647_v12, %v2771_v38  ;;  %v2149_v14 = vpop.f32.mrb[25].mxu1 }
0x13e5   : > { %v1650_v15 = vpop.f32.mrb[26].mxu1 }
0x13e6   : > { %v2150_v16 = vpop.f32.mrb[27].mxu1  ;;  %v1658_v17 = vsel %vm1657_vm4, %v1648_v13, 0.0 }
0x13e7   : > { %1659 = vadd.xlane.f32.xlu1 %v1658_v17 }
0x1474   : > { %v1660_v18 = vpop.xlane.xlu1 %1659 }
0x1475   : > { %v1662_v19 = vmul.f32 0.03125, %v1660_v18 }
0x1477   : > { %v2799_v20 = vsub.f32 %v1648_v13, %v1662_v19 }
0x1479   : > { %v1664_v21 = vmul.f32 %v2799_v20, %v2799_v20 }
0x147b   : > { %v1665_v22 = vsel %vm1657_vm4, %v1664_v21, 0.0 }
0x147c   : > { %1666 = vadd.xlane.f32.xlu0 %v1665_v22 }
0x147d   : > { %2273 = shalt.err (!%p2270_p3)
}
0x147e   : > { %s2274_s18 = scalar_lea.hbm %s2809_s20, 128  ;;  %s2278_s6 = scalar_lea.hbm %s2966_s14, 256 }
0x147f   : > { %p2275_p4 = scmp.ne.s32.totalorder %s2809_s20, %s2274_s18  ;;  %p2279_p9 = scmp.lt.u32.totalorder %s2809_s20, %s2966_s14 }
0x1480   : > { %p2280_p10 = scmp.lt.u32.totalorder %s2278_s6, %s2274_s18  ;;  %p2282_p12 = scmp.lt.u32.totalorder %s2274_s18, %s2809_s20 }
0x1481   : > { %p2276_p7 = pnand %p2275_p4, %p2552_p5 }
0x1482   : > { %p2281_p11 = por %p2280_p10, %p2279_p9 }
0x1483   : > { %p2277_p8 = pneg %p2276_p7 }
0x1484   : > { %p2283_p13 = por %p2282_p12, %p2281_p11 }
0x1486   : > { %p2284_p0 = pnand %p2283_p13, %p2277_p8 }
0x1488   : > { %2287 = shalt.err (!%p2284_p0)
}
0x1489   : > { %s2423_s5 = smov 4   ;;  %s1971_s8 = sshll.u32 %s2533_s25, 6 }
0x148a   : > { %2152 = dma.vmem_to_hbm [thread:$0]  (%p2552_p5), %s2812_s30, 128, %s2809_s20, %s2814_s26, %s2996_s1, %s2996_s1, %s2423_s5  }
0x148b   : > { %s2846_s23 = scalar_lea.hbm %s2967_s15, %s1971_s8  ;;  %s1745_s3 = sshll.u32 %s2712_s19, 4  ;;  %s1746_s3 = int_to_ptr.vmem [resolvable:$true] %s1745_s3 }
0x148c   : > { %s1975_s6 = sshll.u32 %s2533_s25, 5  ;;  %s2288_s2 = scalar_lea.vmem %s1746_s3, 64 }
0x148d   : > { %p2289_p1 = scmp.ne.s32.totalorder %s1746_s3, %s2288_s2  ;;  %s2424_s7 = smov [#allocation8]  }
0x148e   : > { %s2292_s9 = sshll.u32 %s2424_s7, 4  ;;  %s2293_s9 = int_to_ptr.vmem [resolvable:$false] %s2292_s9 }
0x148f   : > { %p2290_p2 = pnand %p2289_p1, %p2552_p5  ;;  %s2294_s10 = scalar_lea.vmem %s2293_s9, 128 }
0x1490   : > { %p2295_p4 = scmp.lt.s32.totalorder %s1746_s3, %s2293_s9  ;;  %p2296_p7 = scmp.lt.s32.totalorder %s2294_s10, %s2288_s2 }
0x1491   : > { %p2291_p3 = pneg %p2290_p2 }
0x1492   : > { %p2297_p8 = por %p2296_p7, %p2295_p4 }
0x1494   : > { %p2298_p9 = pnand %p2297_p8, %p2291_p3 }
0x1496   : > { %2301 = shalt.err (!%p2298_p9)
}
0x1497   : > { %s2302_s1 = scalar_lea.hbm %s2846_s23, 64  ;;  %s2306_s30 = scalar_lea.hbm %s2967_s15, 128 }
0x1498   : > { %p2303_p10 = scmp.ne.s32.totalorder %s2846_s23, %s2302_s1  ;;  %p2307_p13 = scmp.lt.u32.totalorder %s2846_s23, %s2967_s15 }
0x1499   : > { %p2308_p0 = scmp.lt.u32.totalorder %s2306_s30, %s2302_s1  ;;  %p2310_p2 = scmp.lt.u32.totalorder %s2302_s1, %s2846_s23 }
0x149a   : > { %p2304_p11 = pnand %p2303_p10, %p2552_p5 }
0x149b   : > { %p2309_p1 = por %p2308_p0, %p2307_p13 }
0x149c   : > { %p2305_p12 = pneg %p2304_p11 }
0x149d   : > { %p2311_p3 = por %p2310_p2, %p2309_p1 }
0x149f   : > { %p2312_p4 = pnand %p2311_p3, %p2305_p12 }
0x14a1   : > { %2315 = shalt.err (!%p2312_p4)
}
0x14a2   : > { %2153 = dma.vmem_to_hbm [thread:$0]  (%p2552_p5), %s1746_s3, 64, %s2846_s23, %s2814_s26  }
0x14a3   : > { %s2871_s18 = scalar_lea.hbm %s2968_s16, %s1975_s6  ;;  %s1758_s2 = sshll.u32 %s2790_s29, 4  ;;  %s1759_s2 = int_to_ptr.vmem [resolvable:$true] %s1758_s2 }
0x14a4   : > { %s1703_s7 = scalar_lea.sflag [#allocation10], %s2607_s28  ;;  %s2316_s1 = scalar_lea.vmem %s1759_s2, 32 }
0x14a5   : > { %p2317_p7 = scmp.ne.s32.totalorder %s1759_s2, %s2316_s1  ;;  %s2425_s19 = smov [#allocation9]  }
0x14a6   : > { %s2320_s20 = sshll.u32 %s2425_s19, 4  ;;  %s2321_s20 = int_to_ptr.vmem [resolvable:$false] %s2320_s20 }
0x14a7   : > { %p2318_p8 = pnand %p2317_p7, %p2552_p5  ;;  %s2322_s30 = scalar_lea.vmem %s2321_s20, 64 }
0x14a8   : > { %p2323_p10 = scmp.lt.s32.totalorder %s1759_s2, %s2321_s20  ;;  %p2324_p11 = scmp.lt.s32.totalorder %s2322_s30, %s2316_s1 }
0x14a9   : > { %p2319_p9 = pneg %p2318_p8 }
0x14aa   : > { %p2325_p12 = por %p2324_p11, %p2323_p10 }
0x14ac   : > { %p2326_p13 = pnand %p2325_p12, %p2319_p9 }
0x14ae   : > { %2329 = shalt.err (!%p2326_p13)
}
0x14af   : > { %s2330_s29 = scalar_lea.hbm %s2871_s18, 32  ;;  %s2334_s3 = scalar_lea.hbm %s2968_s16, 64 }
0x14b0   : > { %p2331_p0 = scmp.ne.s32.totalorder %s2871_s18, %s2330_s29  ;;  %p2335_p3 = scmp.lt.u32.totalorder %s2871_s18, %s2968_s16 }
0x14b1   : > { %p2336_p4 = scmp.lt.u32.totalorder %s2334_s3, %s2330_s29  ;;  %p2338_p8 = scmp.lt.u32.totalorder %s2330_s29, %s2871_s18 }
0x14b2   : > { %p2332_p1 = pnand %p2331_p0, %p2552_p5 }
0x14b3   : > { %p2337_p7 = por %p2336_p4, %p2335_p3 }
0x14b4   : > { %p2333_p2 = pneg %p2332_p1 }
0x14b5   : > { %p2339_p9 = por %p2338_p8, %p2337_p7 }
0x14b7   : > { %p2340_p10 = pnand %p2339_p9, %p2333_p2 }
0x14b9   : > { %2343 = shalt.err (!%p2340_p10)
}
0x14ba   : > { %2154 = dma.vmem_to_hbm [thread:$0]  (%p2552_p5), %s1759_s2, 32, %s2871_s18, %s1703_s7   ;;  %v1965_v27 = vld [vmem:[%s2963_s11] ss:$0 sm:$0xff] }
0x14bb   : > { %v1966_v29 = vld [vmem:[%s2964_s12] ss:$0 sm:$0xff]  ;;  %s3006_s19 = sshll.u32 %s2607_s28, 2  ;;  %s2906_s30 = scalar_lea.hbm %s2965_s13, %s1971_s8 }
0x14bc   : > { %s521_s20 = scalar_lea.vmem [#allocation4], %s3006_s19  ;;  %s1688_s29 = scalar_lea.sflag [#allocation5], %s2607_s28 }
0x14bd   : > { %s1716_s18 = sshll.u32 %s521_s20, 4  ;;  %s2426_s23 = smov [#allocation4]   ;;  %s2908_s18 = int_to_ptr.vmem [resolvable:$true] %s1716_s18 }
0x14be   : > { %s2344_s26 = scalar_lea.vmem %s2908_s18, 64  ;;  %s2348_s25 = sshll.u32 %s2426_s23, 4  ;;  %s2349_s25 = int_to_ptr.vmem [resolvable:$false] %s2348_s25 }
0x14bf   : > { %p2345_p11 = scmp.ne.s32.totalorder %s2908_s18, %s2344_s26  ;;  %s2350_s3 = scalar_lea.vmem %s2349_s25, 128 }
0x14c0   : > { %p2351_p0 = scmp.lt.s32.totalorder %s2908_s18, %s2349_s25  ;;  %p2352_p1 = scmp.lt.s32.totalorder %s2350_s3, %s2344_s26 }
0x14c1   : > { %p2346_p12 = pnand %p2345_p11, %p2552_p5 }
0x14c2   : > { %p2353_p2 = por %p2352_p1, %p2351_p0 }
0x14c3   : > { %p2347_p13 = pneg %p2346_p12 }
0x14c5   : > { %p2354_p3 = pnand %p2353_p2, %p2347_p13 }
0x1509   : > { %v1667_v23 = vpop.xlane.xlu0 %1666 }
0x150a   : > { %v1668_v24 = vmul.f32 0.03125, %v1667_v23 }
0x150c   : > { %v1669_v25 = vadd.f32 1e-05, %v1668_v24 }
0x150e   : > { %2258 = vrsqrt.f32 %v1669_v25 }
0x1518   : > { %v2259_v26 = vpop.eup %2258 }
0x1519   : > { %v1671_v28 = vmul.f32 %v2259_v26, %v2799_v20 }
0x151b   : > { %v1678_v30 = vmul.f32 %v1965_v27, %v1671_v28 }
0x151d   : > { %v1685_v31 = vadd.f32 %v1966_v29, %v1678_v30 }
0x151f   : > { %1686 = vst.msk [vmem:[%s521_s20] sm:$0xf] %vm1657_vm4, %v1685_v31 }
0x1520   : > { %2357 = shalt.err (!%p2354_p3)
}
0x1521   : > { %s2358_s28 = scalar_lea.hbm %s2906_s30, 64  ;;  %s2362_s5 = scalar_lea.hbm %s2965_s13, 128 }
0x1522   : > { %p2359_p4 = scmp.ne.s32.totalorder %s2906_s30, %s2358_s28  ;;  %p2363_p9 = scmp.lt.u32.totalorder %s2906_s30, %s2965_s13 }
0x1523   : > { %p2364_p10 = scmp.lt.u32.totalorder %s2362_s5, %s2358_s28  ;;  %p2366_p12 = scmp.lt.u32.totalorder %s2358_s28, %s2906_s30 }
0x1524   : > { %p2360_p7 = pnand %p2359_p4, %p2552_p5 }
0x1525   : > { %p2365_p11 = por %p2364_p10, %p2363_p9 }
0x1526   : > { %p2361_p8 = pneg %p2360_p7 }
0x1527   : > { %p2367_p13 = por %p2366_p12, %p2365_p11 }
0x1529   : > { %p2368_p0 = pnand %p2367_p13, %p2361_p8 }
0x152b   : > { %2371 = shalt.err (!%p2368_p0)
}
0x152c   : > { %2151 = dma.vmem_to_hbm [thread:$0]  (%p2552_p5), %s2908_s18, 64, %s2906_s30, %s1688_s29  }
0x152d PF: > { %p2172_p1 = scmp.ge.s32.totalorder %s2414_s24, 2  ;;  %s1770_s4 = sand.u32 1, %s2402_s21  }
0x152e   : > { %s1771_s1 = scalar_lea.sflag [#allocation5], %s1770_s4 }
0x152f   : > { %p2160_p2 = pnand %p2172_p1, %p2556_p6 }
0x1531   : > { %2389 = dma.done.wait (!%p2160_p2), %s1771_s1, 64  }
0x1532   : > { %2391 = vsyncadd (!%p2160_p2), %s1771_s1, 4294967232  ;;  %s3007_s19 = sadd.s32 4294967294, %s2414_s24  }
0x1533   : > { %s1779_s20 = sand.u32 1, %s3007_s19  }
0x1534   : > { %s1780_s2 = scalar_lea.sflag [#allocation7], %s1779_s20 }
0x1535   : > { %2393 = dma.done.wait (!%p2160_p2), %s1780_s2, 192  }
0x1536   : > { %2395 = vsyncadd (!%p2160_p2), %s1780_s2, 4294967104  ;;  %s1798_s0 = scalar_lea.sflag [#allocation10], %s1770_s4 }
0x1537   : > { %2397 = dma.done.wait (!%p2160_p2), %s1798_s0, 32  }
0x1538   : > { %2399 = vsyncadd (!%p2160_p2), %s1798_s0, 4294967264  ;;  %s3008_s18 = sld [smem:[#allocation14_spill]]  ;;  %s3009_s23 = sld [smem:[#allocation15_spill]] }
0x1539   : > { %p33_p5 = scmp.ge.s32.totalorder %s2537_s27, 4   ;;  %s3010_s21 = smov %s2406_s22 }
0x153a   : > { %s3012_s24 = smov %s2537_s27 }
0x153b   :  { %35 = sbr.rel (!%p33_p5) target bundleno = 19 (0x13), region = 158 }
0x153e   : > { %s3011_s22 = smov %s3008_s18 }
0x1542   :  { %1803 = vsyncpa [#allocation5], 1 }
0x1543   :  { %1805 = vsyncpa [#allocation5 + $0x1], 1 }
0x1544   :  { %1806 = vsyncpa [#allocation7], 1 }
0x1545   :  { %1808 = vsyncpa [#allocation7 + $0x1], 1 }
0x1546   :  { %1809 = vsyncpa [#allocation10], 1 }
0x1547   :  { %1811 = vsyncpa [#allocation10 + $0x1], 1 }

</bundles_post_ra>
